<compile_context>
chip_gen: v5e
topology: v5e:2x2
jax: 0.10.0
libtpu: 0.0.40
codegen_flags: <defaults>
</compile_context>

<pallas_src>
import math
import functools

import jax
import jax.numpy as jnp
import numpy as np
from jax.experimental import pallas as pl
from jax.experimental.pallas import tpu as pltpu


# --------------------------------------------------------------------------
# layernorm helpers (torch-module semantics: unbiased std, eps added to std)
# --------------------------------------------------------------------------
def _layernorm(y, gamma, beta, eps=1e-6):
    mean = jnp.mean(y, axis=-1, keepdims=True)
    diff = y - mean
    var = jnp.sum(diff * diff, axis=-1, keepdims=True) / (y.shape[-1] - 1)
    inv = pl.reciprocal(jnp.sqrt(var) + eps, approx=False)
    return gamma * (diff * inv) + beta


def _layernorm_ref(y, gamma, beta, eps=1e-6):
    mean = jnp.mean(y, axis=-1, keepdims=True)
    diff = y - mean
    var = jnp.sum(diff * diff, axis=-1, keepdims=True) / (y.shape[-1] - 1)
    std = jnp.sqrt(var)
    return gamma * diff / (std + eps) + beta


# --------------------------------------------------------------------------
# fused encoder-stack kernel (one grid step == one encoder layer)
# --------------------------------------------------------------------------
def encoder_stack_kernel(x0_ref, wqkv_ref, wo_ref, w1_ref, w2_ref, vec_ref,
                         out_ref, *, n_heads, d_model, d_ff, batch, seq):
    l = pl.program_id(0)
    D = d_model
    H = n_heads
    d_k = D // H
    N = batch * seq
    scale = 1.0 / math.sqrt(d_k)

    # ---- layer 0: seed the resident carry (out_ref) with emb*sqrt(d)+pe ----
    @pl.when(l == 0)
    def _():
        out_ref[...] = x0_ref[...]

    x = out_ref[...]                                   # (N, D), resident in VMEM

    # ---- unpack the coalesced per-layer vectors (single DMA per layer) ----
    vecs = vec_ref[0]                                  # (8, Wpad)
    bqkv = vecs[0:1, :3 * D]
    bo = vecs[1:2, :D]
    g1 = vecs[2:3, :D]
    s1 = vecs[3:4, :D]
    b1 = vecs[4:5, :d_ff]
    b2 = vecs[5:6, :D]
    g2 = vecs[6:7, :D]
    s2 = vecs[7:8, :D]

    # ---- fused QKV projection: one (N, D) @ (D, 3D) MXU matmul ----
    qkv = jnp.dot(x, wqkv_ref[0], preferred_element_type=jnp.float32) + bqkv

    # split into per-(head, batch) blocks: (H*B, S, d_k), leading index = h*B + b
    def split_heads(base):
        return jnp.concatenate(
            [qkv[:, base + h * d_k: base + (h + 1) * d_k].reshape(batch, seq, d_k)
             for h in range(H)], axis=0)

    q3 = split_heads(0)
    k3 = split_heads(D)
    v3 = split_heads(2 * D)

    # ---- batched scaled dot-product attention over all (head, batch) pairs ----
    scores = jnp.einsum('nqd,nkd->nqk', q3, k3,
                        preferred_element_type=jnp.float32) * scale      # (H*B, S, S)
    m = jnp.max(scores, axis=-1, keepdims=True)
    p = jnp.exp(scores - m)
    w = p * pl.reciprocal(jnp.sum(p, axis=-1, keepdims=True), approx=False)
    ctx = jnp.einsum('nqk,nkd->nqd', w, v3,
                     preferred_element_type=jnp.float32)                 # (H*B, S, d_k)

    # ---- merge heads back to an (N, D) slab (inverse of split_heads) ----
    ctx2d = jnp.concatenate(
        [ctx[h * batch:(h + 1) * batch].reshape(N, d_k) for h in range(H)],
        axis=1)                                                          # (N, D)

    # ---- output projection: one (N, D) @ (D, D) matmul (Wo NOT replicated) ----
    attn = jnp.dot(ctx2d, wo_ref[0], preferred_element_type=jnp.float32) + bo

    # ---- residual 1 + LayerNorm (dropout = identity) ----
    x1 = _layernorm(x + attn, g1, s1)

    # ---- feed-forward ----
    h1 = jnp.maximum(
        jnp.dot(x1, w1_ref[0], preferred_element_type=jnp.float32) + b1, 0.0)
    ff = jnp.dot(h1, w2_ref[0], preferred_element_type=jnp.float32) + b2

    # ---- residual 2 + LayerNorm; write-back IS the carry to the next layer ----
    out_ref[...] = _layernorm(x1 + ff, g2, s2)


# --------------------------------------------------------------------------
# wrapper: stack per-layer params along a leading L axis and call the kernel
# --------------------------------------------------------------------------
def _stack_layer_params(layers, d_model, d_ff):
    L = len(layers)
    D = d_model
    st = lambda name: jnp.stack([lp[name] for lp in layers])

    wqkv = jnp.concatenate([st("wq"), st("wk"), st("wv")], axis=-1)      # (L, D, 3D)
    wo = st("wo")                                                        # (L, D, D)
    w1 = st("w1")                                                        # (L, D, d_ff)
    w2 = st("w2")                                                        # (L, d_ff, D)

    wpad = max(3 * D, d_ff, D)
    wpad = ((wpad + 127) // 128) * 128

    def pad(v):
        return jnp.pad(v, ((0, 0), (0, wpad - v.shape[-1])))

    bqkv = jnp.concatenate([st("bq"), st("bk"), st("bv")], axis=-1)      # (L, 3D)
    vec = jnp.stack([pad(bqkv), pad(st("bo")),
                     pad(st("ln1_g")), pad(st("ln1_b")),
                     pad(st("b1")), pad(st("b2")),
                     pad(st("ln2_g")), pad(st("ln2_b"))], axis=1)        # (L, 8, wpad)
    return wqkv, wo, w1, w2, vec


def encoder_forward(tokens, params, n_heads, d_model):
    B, S = tokens.shape
    D = d_model
    N = B * S
    H = n_heads
    d_k = D // H
    L = len(params["layers"])
    d_ff = params["layers"][0]["w1"].shape[1]

    # fused embedding scale + positional encoding, computed once in the wrapper
    x0 = (params["emb"][tokens].astype(jnp.float32) * math.sqrt(d_model)
          + params["pe"][:S][None].astype(jnp.float32)).reshape(N, D)

    wqkv, wo, w1, w2, vec = _stack_layer_params(params["layers"], D, d_ff)
    wpad = vec.shape[-1]

    in_specs = [
        pl.BlockSpec((N, D), lambda l: (0, 0)),                 # x0 (fetched once)
        pl.BlockSpec((1, D, 3 * D), lambda l: (l, 0, 0)),       # wqkv
        pl.BlockSpec((1, D, D), lambda l: (l, 0, 0)),           # wo
        pl.BlockSpec((1, D, d_ff), lambda l: (l, 0, 0)),        # w1
        pl.BlockSpec((1, d_ff, D), lambda l: (l, 0, 0)),        # w2
        pl.BlockSpec((1, 8, wpad), lambda l: (l, 0, 0)),        # packed vectors
    ]

    # cost estimate
    flops = L * (2 * N * D * 3 * D                      # fused QKV
                 + 2 * (H * B) * S * S * d_k * 2        # scores + ctx
                 + 2 * N * D * D                        # output projection
                 + 2 * N * D * d_ff + 2 * N * d_ff * D) # FFN
    transcendentals = L * H * B * S * S
    per_layer_w = 3 * D * D + D * D + D * d_ff + d_ff * D + 8 * wpad
    bytes_accessed = 4 * (2 * N * D + L * per_layer_w)

    # VMEM budget: carry + x0 + double-buffered weights + intermediates (f32)
    interm = (N * 3 * D + 4 * (H * B) * S * d_k + 2 * (H * B) * S * S
              + N * d_ff + 6 * N * D)
    budget = 4 * (3 * N * D + 2 * per_layer_w + interm)
    vmem_limit = int(min(64 << 20, max(32 << 20, 2 * budget)))

    kernel = functools.partial(encoder_stack_kernel, n_heads=H, d_model=D,
                               d_ff=d_ff, batch=B, seq=S)

    out = pl.pallas_call(
        kernel,
        out_shape=jax.ShapeDtypeStruct((N, D), jnp.float32),
        grid=(L,),
        in_specs=in_specs,
        out_specs=pl.BlockSpec((N, D), lambda l: (0, 0)),       # resident carry
        compiler_params=pltpu.CompilerParams(
            dimension_semantics=("arbitrary",),
            vmem_limit_bytes=vmem_limit),
        cost_estimate=pl.CostEstimate(flops=int(flops),
                                      transcendentals=int(transcendentals),
                                      bytes_accessed=int(bytes_accessed)),
    )(x0, wqkv, wo, w1, w2, vec)
    return out.reshape(B, S, D)


# --------------------------------------------------------------------------
# pure-JAX reference (for correctness check)
# --------------------------------------------------------------------------
def _layer_ref(x, p, n_heads):
    B, S, D = x.shape
    d_k = D // n_heads
    q = x @ p["wq"] + p["bq"]
    k = x @ p["wk"] + p["bk"]
    v = x @ p["wv"] + p["bv"]
    split = lambda t: t.reshape(B, S, n_heads, d_k).transpose(0, 2, 1, 3)
    qh, kh, vh = split(q), split(k), split(v)
    scores = jnp.einsum("bhqd,bhkd->bhqk", qh, kh) / math.sqrt(d_k)
    w = jax.nn.softmax(scores, axis=-1)
    attn = jnp.einsum("bhqk,bhkd->bhqd", w, vh).transpose(0, 2, 1, 3).reshape(B, S, D)
    attn = attn @ p["wo"] + p["bo"]
    x1 = _layernorm_ref(x + attn, p["ln1_g"], p["ln1_b"])
    h1 = jax.nn.relu(x1 @ p["w1"] + p["b1"])
    ff = h1 @ p["w2"] + p["b2"]
    return _layernorm_ref(x1 + ff, p["ln2_g"], p["ln2_b"])


def encoder_forward_ref(tokens, params, n_heads, d_model):
    S = tokens.shape[1]
    x = params["emb"][tokens] * math.sqrt(d_model) + params["pe"][:S][None]
    for lp in params["layers"]:
        x = _layer_ref(x, lp, n_heads)
    return x


# --------------------------------------------------------------------------
# deterministic parameter init
# --------------------------------------------------------------------------
def positional_encoding(max_len, d_model):
    position = jnp.arange(max_len, dtype=jnp.float32)[:, None]
    div_term = jnp.exp(jnp.arange(0, d_model, 2, dtype=jnp.float32)
                       * (-math.log(10000.0) / d_model))
    pe = jnp.zeros((max_len, d_model), jnp.float32)
    pe = pe.at[:, 0::2].set(jnp.sin(position * div_term))
    pe = pe.at[:, 1::2].set(jnp.cos(position * div_term))
    return pe


def init_params(key, vocab_size, d_model, max_len, n_heads, d_ff, num_layers):
    keys = jax.random.split(key, 1 + num_layers)
    params = {
        "emb": jax.random.normal(keys[0], (vocab_size, d_model), jnp.float32),
        "pe": positional_encoding(max_len, d_model),
        "layers": [],
    }

    def lin(k, fan_in, fan_out):
        bound = 1.0 / math.sqrt(fan_in)
        return jax.random.uniform(k, (fan_in, fan_out), jnp.float32, -bound, bound)

    for l in range(num_layers):
        ks = jax.random.split(keys[1 + l], 6)
        lp = {
            "wq": lin(ks[0], d_model, d_model), "bq": jnp.zeros((d_model,), jnp.float32),
            "wk": lin(ks[1], d_model, d_model), "bk": jnp.zeros((d_model,), jnp.float32),
            "wv": lin(ks[2], d_model, d_model), "bv": jnp.zeros((d_model,), jnp.float32),
            "wo": lin(ks[3], d_model, d_model), "bo": jnp.zeros((d_model,), jnp.float32),
            "ln1_g": jnp.ones((d_model,), jnp.float32),
            "ln1_b": jnp.zeros((d_model,), jnp.float32),
            "w1": lin(ks[4], d_model, d_ff), "b1": jnp.zeros((d_ff,), jnp.float32),
            "w2": lin(ks[5], d_ff, d_model), "b2": jnp.zeros((d_model,), jnp.float32),
            "ln2_g": jnp.ones((d_model,), jnp.float32),
            "ln2_b": jnp.zeros((d_model,), jnp.float32),
        }
        params["layers"].append(lp)
    return params


# --------------------------------------------------------------------------
if __name__ == "__main__":
    d_model, vocab_size, max_len = 32, 50, 16
    n_heads, d_ff, num_layers = 4, 64, 2
    B, S = 2, 8

    key = jax.random.PRNGKey(0)
    pkey, tkey = jax.random.split(key)
    params = init_params(pkey, vocab_size, d_model, max_len, n_heads, d_ff, num_layers)
    tokens = jax.random.randint(tkey, (B, S), 0, vocab_size, dtype=jnp.int32)

    out = encoder_forward(tokens, params, n_heads, d_model)
    out = jax.block_until_ready(out)
    assert out.shape == (B, S, d_model)

    ref = encoder_forward_ref(tokens, params, n_heads, d_model)
    np.testing.assert_allclose(np.asarray(out), np.asarray(ref), rtol=2e-4, atol=2e-4)

    print("KERNEL_OK")
</pallas_src>

<mosaic_0001>
module attributes {stable_mosaic.version = 11 : i64} {
  func.func @encoder_stack_kernel(%arg0: i32, %arg1: memref<16x32xf32, #tpu.memory_space<vmem>>, %arg2: memref<1x32x96xf32, #tpu.memory_space<vmem>>, %arg3: memref<1x32x32xf32, #tpu.memory_space<vmem>>, %arg4: memref<1x32x64xf32, #tpu.memory_space<vmem>>, %arg5: memref<1x64x32xf32, #tpu.memory_space<vmem>>, %arg6: memref<1x8x128xf32, #tpu.memory_space<vmem>>, %arg7: memref<16x32xf32, #tpu.memory_space<vmem>>) attributes {dimension_semantics = [#tpu.dimension_semantics<arbitrary>], iteration_bounds = array<i64: 2>, scalar_prefetch = 0 : i64, scratch_operands = 0 : i64, tpu.core_type = #tpu.core_type<tc>, window_params = [{pipeline_mode = #tpu.pipeline_mode<synchronous>, transform_indices = @transform_0, window_bounds = array<i64: 16, 32>}, {transform_indices = @transform_1, window_bounds = array<i64: 1, 32, 96>}, {transform_indices = @transform_2, window_bounds = array<i64: 1, 32, 32>}, {transform_indices = @transform_3, window_bounds = array<i64: 1, 32, 64>}, {transform_indices = @transform_4, window_bounds = array<i64: 1, 64, 32>}, {transform_indices = @transform_5, window_bounds = array<i64: 1, 8, 128>}, {pipeline_mode = #tpu.pipeline_mode<synchronous>, transform_indices = @transform_6, window_bounds = array<i64: 16, 32>}]} {
    %c0_i32 = arith.constant 0 : i32
    %0 = arith.cmpi eq, %arg0, %c0_i32 : i32
    %1 = arith.extui %0 : i1 to i32
    %c0_i32_0 = arith.constant 0 : i32
    %2 = arith.cmpi ne, %1, %c0_i32_0 : i32
    scf.if %2 {
      %c0_38 = arith.constant 0 : index
      %c0_39 = arith.constant 0 : index
      %131 = vector.load %arg1[%c0_38, %c0_39] : memref<16x32xf32, #tpu.memory_space<vmem>>, vector<16x32xf32>
      %c0_40 = arith.constant 0 : index
      %c0_41 = arith.constant 0 : index
      %132 = vector.load %arg7[%c0_40, %c0_41] : memref<16x32xf32, #tpu.memory_space<vmem>>, vector<16x32xf32>
      tpu.vector_store %arg7[%c0_40, %c0_41], %131 {strides = array<i32>} : memref<16x32xf32, #tpu.memory_space<vmem>>, vector<16x32xf32>,
    } else {
    }
    %c0 = arith.constant 0 : index
    %c0_1 = arith.constant 0 : index
    %3 = vector.load %arg7[%c0, %c0_1] : memref<16x32xf32, #tpu.memory_space<vmem>>, vector<16x32xf32>
    %c0_2 = arith.constant 0 : index
    %c0_3 = arith.constant 0 : index
    %c0_4 = arith.constant 0 : index
    %4 = vector.load %arg6[%c0_2, %c0_3, %c0_4] : memref<1x8x128xf32, #tpu.memory_space<vmem>>, vector<1x8x128xf32>
    %5 = vector.shape_cast %4 : vector<1x8x128xf32> to vector<8x128xf32>
    %6 = vector.extract_strided_slice %5 {offsets = [0, 0], sizes = [1, 96], strides = [1, 1]} : vector<8x128xf32> to vector<1x96xf32>
    %7 = vector.extract_strided_slice %5 {offsets = [1, 0], sizes = [1, 32], strides = [1, 1]} : vector<8x128xf32> to vector<1x32xf32>
    %8 = vector.extract_strided_slice %5 {offsets = [2, 0], sizes = [1, 32], strides = [1, 1]} : vector<8x128xf32> to vector<1x32xf32>
    %9 = vector.extract_strided_slice %5 {offsets = [3, 0], sizes = [1, 32], strides = [1, 1]} : vector<8x128xf32> to vector<1x32xf32>
    %10 = vector.extract_strided_slice %5 {offsets = [4, 0], sizes = [1, 64], strides = [1, 1]} : vector<8x128xf32> to vector<1x64xf32>
    %11 = vector.extract_strided_slice %5 {offsets = [5, 0], sizes = [1, 32], strides = [1, 1]} : vector<8x128xf32> to vector<1x32xf32>
    %12 = vector.extract_strided_slice %5 {offsets = [6, 0], sizes = [1, 32], strides = [1, 1]} : vector<8x128xf32> to vector<1x32xf32>
    %13 = vector.extract_strided_slice %5 {offsets = [7, 0], sizes = [1, 32], strides = [1, 1]} : vector<8x128xf32> to vector<1x32xf32>
    %c0_5 = arith.constant 0 : index
    %c0_6 = arith.constant 0 : index
    %c0_7 = arith.constant 0 : index
    %14 = vector.load %arg2[%c0_5, %c0_6, %c0_7] : memref<1x32x96xf32, #tpu.memory_space<vmem>>, vector<1x32x96xf32>
    %15 = vector.shape_cast %14 : vector<1x32x96xf32> to vector<32x96xf32>
    %cst = arith.constant dense<0.000000e+00> : vector<16x96xf32>
    %16 = tpu.matmul %3, %15, %cst {dimension_numbers = #tpu.dot_dimension_numbers<[1], [0], [0], [1], [0, 0, 1, 1], [], []>} : vector<16x32xf32>, vector<32x96xf32>, vector<16x96xf32> -> vector<16x96xf32>
    %17 = vector.broadcast %6 : vector<1x96xf32> to vector<16x96xf32>
    %18 = arith.addf %16, %17 : vector<16x96xf32>
    %19 = vector.extract_strided_slice %18 {offsets = [0, 0], sizes = [16, 8], strides = [1, 1]} : vector<16x96xf32> to vector<16x8xf32>
    %20 = vector.shape_cast %19 : vector<16x8xf32> to vector<2x8x8xf32>
    %21 = vector.extract_strided_slice %18 {offsets = [0, 8], sizes = [16, 8], strides = [1, 1]} : vector<16x96xf32> to vector<16x8xf32>
    %22 = vector.shape_cast %21 : vector<16x8xf32> to vector<2x8x8xf32>
    %23 = vector.extract_strided_slice %18 {offsets = [0, 16], sizes = [16, 8], strides = [1, 1]} : vector<16x96xf32> to vector<16x8xf32>
    %24 = vector.shape_cast %23 : vector<16x8xf32> to vector<2x8x8xf32>
    %25 = vector.extract_strided_slice %18 {offsets = [0, 24], sizes = [16, 8], strides = [1, 1]} : vector<16x96xf32> to vector<16x8xf32>
    %26 = vector.shape_cast %25 : vector<16x8xf32> to vector<2x8x8xf32>
    %27 = tpu.concatenate %20, %22, %24, %26 in 0 : vector<2x8x8xf32>, vector<2x8x8xf32>, vector<2x8x8xf32>, vector<2x8x8xf32> -> vector<8x8x8xf32>
    %28 = vector.extract_strided_slice %18 {offsets = [0, 32], sizes = [16, 8], strides = [1, 1]} : vector<16x96xf32> to vector<16x8xf32>
    %29 = vector.shape_cast %28 : vector<16x8xf32> to vector<2x8x8xf32>
    %30 = vector.extract_strided_slice %18 {offsets = [0, 40], sizes = [16, 8], strides = [1, 1]} : vector<16x96xf32> to vector<16x8xf32>
    %31 = vector.shape_cast %30 : vector<16x8xf32> to vector<2x8x8xf32>
    %32 = vector.extract_strided_slice %18 {offsets = [0, 48], sizes = [16, 8], strides = [1, 1]} : vector<16x96xf32> to vector<16x8xf32>
    %33 = vector.shape_cast %32 : vector<16x8xf32> to vector<2x8x8xf32>
    %34 = vector.extract_strided_slice %18 {offsets = [0, 56], sizes = [16, 8], strides = [1, 1]} : vector<16x96xf32> to vector<16x8xf32>
    %35 = vector.shape_cast %34 : vector<16x8xf32> to vector<2x8x8xf32>
    %36 = tpu.concatenate %29, %31, %33, %35 in 0 : vector<2x8x8xf32>, vector<2x8x8xf32>, vector<2x8x8xf32>, vector<2x8x8xf32> -> vector<8x8x8xf32>
    %37 = vector.extract_strided_slice %18 {offsets = [0, 64], sizes = [16, 8], strides = [1, 1]} : vector<16x96xf32> to vector<16x8xf32>
    %38 = vector.shape_cast %37 : vector<16x8xf32> to vector<2x8x8xf32>
    %39 = vector.extract_strided_slice %18 {offsets = [0, 72], sizes = [16, 8], strides = [1, 1]} : vector<16x96xf32> to vector<16x8xf32>
    %40 = vector.shape_cast %39 : vector<16x8xf32> to vector<2x8x8xf32>
    %41 = vector.extract_strided_slice %18 {offsets = [0, 80], sizes = [16, 8], strides = [1, 1]} : vector<16x96xf32> to vector<16x8xf32>
    %42 = vector.shape_cast %41 : vector<16x8xf32> to vector<2x8x8xf32>
    %43 = vector.extract_strided_slice %18 {offsets = [0, 88], sizes = [16, 8], strides = [1, 1]} : vector<16x96xf32> to vector<16x8xf32>
    %44 = vector.shape_cast %43 : vector<16x8xf32> to vector<2x8x8xf32>
    %45 = tpu.concatenate %38, %40, %42, %44 in 0 : vector<2x8x8xf32>, vector<2x8x8xf32>, vector<2x8x8xf32>, vector<2x8x8xf32> -> vector<8x8x8xf32>
    "tpu.trace_start"() <{level = 10 : i32, message = "nqd,nkd->nqk"}> : () -> ()
    %cst_8 = arith.constant dense<0.000000e+00> : vector<8x8x8xf32>
    %46 = tpu.matmul %27, %36, %cst_8 {dimension_numbers = #tpu.dot_dimension_numbers<[2], [2], [1], [1], [0, 0, 0, 1, 1, 1], [0], [0]>} : vector<8x8x8xf32>, vector<8x8x8xf32>, vector<8x8x8xf32> -> vector<8x8x8xf32>
    "tpu.trace_stop"() : () -> ()
    %cst_9 = arith.constant 0.353553385 : f32
    %47 = vector.broadcast %cst_9 : f32 to vector<8x8x8xf32>
    %48 = arith.mulf %46, %47 : vector<8x8x8xf32>
    %cst_10 = arith.constant dense<0xFF800000> : vector<8x8xf32>
    %49 = vector.multi_reduction <maximumf>, %48, %cst_10 [2] : vector<8x8x8xf32> to vector<8x8xf32>
    %50 = vector.shape_cast %49 : vector<8x8xf32> to vector<8x8x1xf32>
    %51 = vector.broadcast %50 : vector<8x8x1xf32> to vector<8x8x8xf32>
    %52 = arith.subf %48, %51 : vector<8x8x8xf32>
    %53 = math.exp %52 : vector<8x8x8xf32>
    %cst_11 = arith.constant dense<0.000000e+00> : vector<8x8xf32>
    %54 = vector.multi_reduction <add>, %53, %cst_11 [2] : vector<8x8x8xf32> to vector<8x8xf32>
    %55 = vector.shape_cast %54 : vector<8x8xf32> to vector<8x8x1xf32>
    %56 = tpu.reciprocal %55 : vector<8x8x1xf32> -> vector<8x8x1xf32>
    %57 = vector.broadcast %56 : vector<8x8x1xf32> to vector<8x8x8xf32>
    %58 = arith.mulf %53, %57 : vector<8x8x8xf32>
    "tpu.trace_start"() <{level = 10 : i32, message = "nqk,nkd->nqd"}> : () -> ()
    %cst_12 = arith.constant dense<0.000000e+00> : vector<8x8x8xf32>
    %59 = tpu.matmul %58, %45, %cst_12 {dimension_numbers = #tpu.dot_dimension_numbers<[2], [1], [1], [2], [0, 0, 0, 1, 1, 2], [0], [0]>} : vector<8x8x8xf32>, vector<8x8x8xf32>, vector<8x8x8xf32> -> vector<8x8x8xf32>
    "tpu.trace_stop"() : () -> ()
    %60 = vector.extract_strided_slice %59 {offsets = [0, 0, 0], sizes = [2, 8, 8], strides = [1, 1, 1]} : vector<8x8x8xf32> to vector<2x8x8xf32>
    %61 = vector.shape_cast %60 : vector<2x8x8xf32> to vector<16x8xf32>
    %62 = vector.extract_strided_slice %59 {offsets = [2, 0, 0], sizes = [2, 8, 8], strides = [1, 1, 1]} : vector<8x8x8xf32> to vector<2x8x8xf32>
    %63 = vector.shape_cast %62 : vector<2x8x8xf32> to vector<16x8xf32>
    %64 = vector.extract_strided_slice %59 {offsets = [4, 0, 0], sizes = [2, 8, 8], strides = [1, 1, 1]} : vector<8x8x8xf32> to vector<2x8x8xf32>
    %65 = vector.shape_cast %64 : vector<2x8x8xf32> to vector<16x8xf32>
    %66 = vector.extract_strided_slice %59 {offsets = [6, 0, 0], sizes = [2, 8, 8], strides = [1, 1, 1]} : vector<8x8x8xf32> to vector<2x8x8xf32>
    %67 = vector.shape_cast %66 : vector<2x8x8xf32> to vector<16x8xf32>
    %68 = tpu.concatenate %61, %63, %65, %67 in 1 : vector<16x8xf32>, vector<16x8xf32>, vector<16x8xf32>, vector<16x8xf32> -> vector<16x32xf32>
    %c0_13 = arith.constant 0 : index
    %c0_14 = arith.constant 0 : index
    %c0_15 = arith.constant 0 : index
    %69 = vector.load %arg3[%c0_13, %c0_14, %c0_15] : memref<1x32x32xf32, #tpu.memory_space<vmem>>, vector<1x32x32xf32>
    %70 = vector.shape_cast %69 : vector<1x32x32xf32> to vector<32x32xf32>
    %cst_16 = arith.constant dense<0.000000e+00> : vector<16x32xf32>
    %71 = tpu.matmul %68, %70, %cst_16 {dimension_numbers = #tpu.dot_dimension_numbers<[1], [0], [0], [1], [0, 0, 1, 1], [], []>} : vector<16x32xf32>, vector<32x32xf32>, vector<16x32xf32> -> vector<16x32xf32>
    %72 = vector.broadcast %7 : vector<1x32xf32> to vector<16x32xf32>
    %73 = arith.addf %71, %72 : vector<16x32xf32>
    %74 = arith.addf %3, %73 : vector<16x32xf32>
    %cst_17 = arith.constant dense<0.000000e+00> : vector<16xf32>
    %75 = vector.multi_reduction <add>, %74, %cst_17 [1] : vector<16x32xf32> to vector<16xf32>
    %76 = vector.shape_cast %75 : vector<16xf32> to vector<16x1xf32>
    %cst_18 = arith.constant 3.200000e+01 : f32
    %77 = vector.broadcast %cst_18 : f32 to vector<16x1xf32>
    %78 = arith.divf %76, %77 : vector<16x1xf32>
    %79 = vector.broadcast %78 : vector<16x1xf32> to vector<16x32xf32>
    %80 = arith.subf %74, %79 : vector<16x32xf32>
    %81 = arith.mulf %80, %80 : vector<16x32xf32>
    %cst_19 = arith.constant dense<0.000000e+00> : vector<16xf32>
    %82 = vector.multi_reduction <add>, %81, %cst_19 [1] : vector<16x32xf32> to vector<16xf32>
    %83 = vector.shape_cast %82 : vector<16xf32> to vector<16x1xf32>
    %cst_20 = arith.constant 3.100000e+01 : f32
    %84 = vector.broadcast %cst_20 : f32 to vector<16x1xf32>
    %85 = arith.divf %83, %84 : vector<16x1xf32>
    %86 = math.sqrt %85 : vector<16x1xf32>
    %cst_21 = arith.constant 9.99999997E-7 : f32
    %87 = vector.broadcast %cst_21 : f32 to vector<16x1xf32>
    %88 = arith.addf %86, %87 : vector<16x1xf32>
    %89 = tpu.reciprocal %88 : vector<16x1xf32> -> vector<16x1xf32>
    %90 = vector.broadcast %89 : vector<16x1xf32> to vector<16x32xf32>
    %91 = arith.mulf %80, %90 : vector<16x32xf32>
    %92 = vector.broadcast %8 : vector<1x32xf32> to vector<16x32xf32>
    %93 = arith.mulf %92, %91 : vector<16x32xf32>
    %94 = vector.broadcast %9 : vector<1x32xf32> to vector<16x32xf32>
    %95 = arith.addf %93, %94 : vector<16x32xf32>
    %c0_22 = arith.constant 0 : index
    %c0_23 = arith.constant 0 : index
    %c0_24 = arith.constant 0 : index
    %96 = vector.load %arg4[%c0_22, %c0_23, %c0_24] : memref<1x32x64xf32, #tpu.memory_space<vmem>>, vector<1x32x64xf32>
    %97 = vector.shape_cast %96 : vector<1x32x64xf32> to vector<32x64xf32>
    %cst_25 = arith.constant dense<0.000000e+00> : vector<16x64xf32>
    %98 = tpu.matmul %95, %97, %cst_25 {dimension_numbers = #tpu.dot_dimension_numbers<[1], [0], [0], [1], [0, 0, 1, 1], [], []>} : vector<16x32xf32>, vector<32x64xf32>, vector<16x64xf32> -> vector<16x64xf32>
    %99 = vector.broadcast %10 : vector<1x64xf32> to vector<16x64xf32>
    %100 = arith.addf %98, %99 : vector<16x64xf32>
    %cst_26 = arith.constant 0.000000e+00 : f32
    %101 = vector.broadcast %cst_26 : f32 to vector<16x64xf32>
    %102 = arith.maximumf %100, %101 : vector<16x64xf32>
    %c0_27 = arith.constant 0 : index
    %c0_28 = arith.constant 0 : index
    %c0_29 = arith.constant 0 : index
    %103 = vector.load %arg5[%c0_27, %c0_28, %c0_29] : memref<1x64x32xf32, #tpu.memory_space<vmem>>, vector<1x64x32xf32>
    %104 = vector.shape_cast %103 : vector<1x64x32xf32> to vector<64x32xf32>
    %cst_30 = arith.constant dense<0.000000e+00> : vector<16x32xf32>
    %105 = tpu.matmul %102, %104, %cst_30 {dimension_numbers = #tpu.dot_dimension_numbers<[1], [0], [0], [1], [0, 0, 1, 1], [], []>} : vector<16x64xf32>, vector<64x32xf32>, vector<16x32xf32> -> vector<16x32xf32>
    %106 = vector.broadcast %11 : vector<1x32xf32> to vector<16x32xf32>
    %107 = arith.addf %105, %106 : vector<16x32xf32>
    %108 = arith.addf %95, %107 : vector<16x32xf32>
    %cst_31 = arith.constant dense<0.000000e+00> : vector<16xf32>
    %109 = vector.multi_reduction <add>, %108, %cst_31 [1] : vector<16x32xf32> to vector<16xf32>
    %110 = vector.shape_cast %109 : vector<16xf32> to vector<16x1xf32>
    %cst_32 = arith.constant 3.200000e+01 : f32
    %111 = vector.broadcast %cst_32 : f32 to vector<16x1xf32>
    %112 = arith.divf %110, %111 : vector<16x1xf32>
    %113 = vector.broadcast %112 : vector<16x1xf32> to vector<16x32xf32>
    %114 = arith.subf %108, %113 : vector<16x32xf32>
    %115 = arith.mulf %114, %114 : vector<16x32xf32>
    %cst_33 = arith.constant dense<0.000000e+00> : vector<16xf32>
    %116 = vector.multi_reduction <add>, %115, %cst_33 [1] : vector<16x32xf32> to vector<16xf32>
    %117 = vector.shape_cast %116 : vector<16xf32> to vector<16x1xf32>
    %cst_34 = arith.constant 3.100000e+01 : f32
    %118 = vector.broadcast %cst_34 : f32 to vector<16x1xf32>
    %119 = arith.divf %117, %118 : vector<16x1xf32>
    %120 = math.sqrt %119 : vector<16x1xf32>
    %cst_35 = arith.constant 9.99999997E-7 : f32
    %121 = vector.broadcast %cst_35 : f32 to vector<16x1xf32>
    %122 = arith.addf %120, %121 : vector<16x1xf32>
    %123 = tpu.reciprocal %122 : vector<16x1xf32> -> vector<16x1xf32>
    %124 = vector.broadcast %123 : vector<16x1xf32> to vector<16x32xf32>
    %125 = arith.mulf %114, %124 : vector<16x32xf32>
    %126 = vector.broadcast %12 : vector<1x32xf32> to vector<16x32xf32>
    %127 = arith.mulf %126, %125 : vector<16x32xf32>
    %128 = vector.broadcast %13 : vector<1x32xf32> to vector<16x32xf32>
    %129 = arith.addf %127, %128 : vector<16x32xf32>
    %c0_36 = arith.constant 0 : index
    %c0_37 = arith.constant 0 : index
    %130 = vector.load %arg7[%c0_36, %c0_37] : memref<16x32xf32, #tpu.memory_space<vmem>>, vector<16x32xf32>
    tpu.vector_store %arg7[%c0_36, %c0_37], %129 {strides = array<i32>} : memref<16x32xf32, #tpu.memory_space<vmem>>, vector<16x32xf32>,
    return
  }
  func.func @transform_0(%arg0: i32) -> (i32, i32) {
    %c0_i32 = arith.constant 0 : i32
    %c0_i32_0 = arith.constant 0 : i32
    %c0_i32_1 = arith.constant 0 : i32
    return %c0_i32, %c0_i32_0 : i32, i32
  }
  func.func @transform_1(%arg0: i32) -> (i32, i32, i32) {
    %c0_i32 = arith.constant 0 : i32
    %c0_i32_0 = arith.constant 0 : i32
    %c0_i32_1 = arith.constant 0 : i32
    return %arg0, %c0_i32, %c0_i32_0 : i32, i32, i32
  }
  func.func @transform_2(%arg0: i32) -> (i32, i32, i32) {
    %c0_i32 = arith.constant 0 : i32
    %c0_i32_0 = arith.constant 0 : i32
    %c0_i32_1 = arith.constant 0 : i32
    return %arg0, %c0_i32, %c0_i32_0 : i32, i32, i32
  }
  func.func @transform_3(%arg0: i32) -> (i32, i32, i32) {
    %c0_i32 = arith.constant 0 : i32
    %c0_i32_0 = arith.constant 0 : i32
    %c0_i32_1 = arith.constant 0 : i32
    return %arg0, %c0_i32, %c0_i32_0 : i32, i32, i32
  }
  func.func @transform_4(%arg0: i32) -> (i32, i32, i32) {
    %c0_i32 = arith.constant 0 : i32
    %c0_i32_0 = arith.constant 0 : i32
    %c0_i32_1 = arith.constant 0 : i32
    return %arg0, %c0_i32, %c0_i32_0 : i32, i32, i32
  }
  func.func @transform_5(%arg0: i32) -> (i32, i32, i32) {
    %c0_i32 = arith.constant 0 : i32
    %c0_i32_0 = arith.constant 0 : i32
    %c0_i32_1 = arith.constant 0 : i32
    return %arg0, %c0_i32, %c0_i32_0 : i32, i32, i32
  }
  func.func @transform_6(%arg0: i32) -> (i32, i32) {
    %c0_i32 = arith.constant 0 : i32
    %c0_i32_0 = arith.constant 0 : i32
    %c0_i32_1 = arith.constant 0 : i32
    return %c0_i32, %c0_i32_0 : i32, i32
  }
}

</mosaic_0001>

<bundles_post_ra>
// kernel: tpu_custom_call.1
= control target key start
LH: loop header
LB: loop body
LE: loop exit
PB: predicated region body
PF: predicated region fallthrough
CT: control target
= control target key end

     0   :  { %11 = vsyncpa [#allocation3], 0  ;;  %s2279_s0 = inlined_call_operand.hbm [shape: f32[16,32], index: 0, kind: input, shape index: {}]   ;;  %s2280_s1 = inlined_call_operand.vmem [shape: f32[2,32,96], index: 1, kind: input, shape index: {}]   ;;  %s2281_s2 = inlined_call_operand.vmem [shape: f32[2,32,32], index: 2, kind: input, shape index: {}]   ;;  %s2282_s3 = inlined_call_operand.vmem [shape: f32[2,32,64], index: 3, kind: input, shape index: {}]   ;;  %s2283_s4 = inlined_call_operand.vmem [shape: f32[2,64,32], index: 4, kind: input, shape index: {}]   ;;  %s2284_s5 = inlined_call_operand.hbm [shape: f32[2,8,128], index: 5, kind: input, shape index: {}]   ;;  %s2285_s6 = inlined_call_operand.hbm [shape: f32[16,32], index: 6, kind: output, shape index: {}]  }
   0x1   :  { %12 = vsyncpa [#allocation6], 0 }
   0x2   :  { %14 = vsyncpa [#allocation6 + $0x1], 0 }
   0x3   :  { %15 = vsyncpa [#allocation4], 0  ;;  %s1856_s21 = smov 0   ;;  %s1858_s22 = smov 0  }
   0x4   :  { %s1860_s23 = smov 0   ;;  %s1862_s24 = smov 0  }
   0x5 LB: > { %s209_s27 = sshll.u32 %s2279_s0, 4  ;;  %s1878_s28 = sadd.s32 4294967295, %s1804_s24   ;;  %s1804_s24 = sphi %s1862_s24, %s2302_s24   ;;  %s1800_s23 = sphi %s1860_s23, %s2301_s23   ;;  %s1796_s22 = sphi %s1858_s22, %s2300_s22   ;;  %s1792_s21 = sphi %s1856_s21, %s2299_s21   ;;  %s210_s27 = int_to_ptr.hbm [resolvable:$true] %s209_s27 }
   0x6   : > { %p1479_p0 = scmp.ge.s32.totalorder %s1804_s24, 1  ;;  %p167_p1 = scmp.eq.s32.totalorder %s1878_s28, 0 }
   0x7   : > { %p198_p2 = scmp.lt.s32.totalorder %s1804_s24, 3  ;;  %p1480_p3 = scmp.ne.s32.totalorder %s1878_s28, 0 }
   0x8   : > { %s1806_s30 = smov [#allocation2]   ;;  %s1807_s8 = smov 128  }
   0x9   : > { %p1884_p4 = pnand %p1479_p0, %p198_p2  ;;  %s211_s7 = sshll.u32 %s1806_s30, 4  ;;  %s212_s7 = int_to_ptr.vmem [resolvable:$true] %s211_s7 }
   0xa   : > { %s1808_s9 = smov 8   ;;  %s1893_s10 = sadd.s32 1, %s1804_s24  }
   0xb   : > { %p1546_p5 = pneg %p1884_p4  ;;  %s150_s11 = ssub.s32 %s1804_s24, %s1893_s10 }
   0xc   : > { %s153_s12 = sadd.s32 1, %s1800_s23  ;;  %p151_p7 = scmp.eq.s32.totalorder %s150_s11, 0 }
   0xd   : > { %p1547_p6 = pnand %p1546_p5, %p167_p1  ;;  %p160_p8 = scmp.ne.s32.totalorder %s1800_s23, %s1796_s22 }
   0xe   : > { %p161_p9 = scmp.eq.s32.totalorder %s1804_s24, 0  ;;  %p166_p10 = scmp.ne.s32.totalorder %s1796_s22, %s1792_s21 }
   0xf   : > { %1549 = dma.hbm_to_vmem [thread:$0]  (!%p1547_p6), %s210_s27, 256, %s212_s7, [#allocation3], %s1807_s8, %s1807_s8, %s1808_s9  }
  0x10   : > { %s1903_s13 = scalar_select %p151_p7, %s1800_s23, %s153_s12  }
  0x11   : > { %p162_p11 = por %p161_p9, %p160_p8  ;;  %p1907_p12 = por %p167_p1, %p166_p10 }
  0x12   : > { %p1555_p13 = scmp.lt.s32.totalorder %s1804_s24, 2  ;;  %s257_s15 = sand.u32 1, %s1800_s23  }
  0x13   : > { %s1482_s16 = sshll.u32 %s257_s15, 3  ;;  %s1483_s17 = sshll.u32 %s1804_s24, 3 }
  0x14   : > { %s265_s20 = scalar_lea.hbm %s2284_s5, %s1483_s17  ;;  %s261_s25 = scalar_lea.vmem [#allocation5], %s1482_s16 }
  0x15   : > { %s269_s26 = sshll.u32 %s261_s25, 4  ;;  %s267_s27 = sshll.u32 %s265_s20, 4  ;;  %s270_s26 = int_to_ptr.vmem [resolvable:$true] %s269_s26  ;;  %s268_s27 = int_to_ptr.hbm [resolvable:$true] %s267_s27 }
  0x16   : > { %p1917_p0 = pnand %p1555_p13, %p162_p11  ;;  %s258_s30 = scalar_lea.sflag [#allocation6], %s257_s15 }
  0x17   : > { %s1704_s7 = sshra.s32 %s268_s27, 4  ;;  %s1711_s11 = scalar_lea.hbm %s2284_s5, 16  ;;  %s1705_s7 = int_to_ptr.hbm [resolvable:$true] %s1704_s7 }
  0x18   : > { %s1706_s8 = scalar_lea.hbm %s1705_s7, 8  ;;  %p1708_p5 = pneg %p1917_p0 }
  0x19   : > { %p1707_p2 = scmp.ne.s32.totalorder %s1705_s7, %s1706_s8  ;;  %p1712_p8 = scmp.lt.s32.totalorder %s1705_s7, %s2284_s5 }
  0x1a   : > { %p1713_p9 = scmp.lt.s32.totalorder %s1711_s11, %s1706_s8 }
  0x1b   : > { %p1709_p6 = pnand %p1708_p5, %p1707_p2 }
  0x1c   : > { %p1714_p10 = por %p1713_p9, %p1712_p8 }
  0x1d   : > { %p1710_p7 = pneg %p1709_p6 }
  0x1f   : > { %p1715_p11 = pnand %p1714_p10, %p1710_p7 }
  0x21   : > { %1718 = shalt.err (!%p1715_p11)
}
  0x22   : > { %1553 = dma.hbm_to_vmem [thread:$0]  (!%p1917_p0), %s268_s27, 128, %s270_s26, %s258_s30  }
  0x23   : > { %278 = sbr.rel (%p1884_p4) target bundleno = 2070 (0x816), region = 44 }
  0x28   : > { %1779 = dma.done.wait (%p167_p1), [#allocation3], 256  }
  0x29   : > { %1781 = vsyncadd (%p167_p1), [#allocation3], 4294967040  ;;  %s285_s15 = sand.u32 1, %s1796_s22  }
  0x2a   : > { %s1938_s17 = sshll.u32 %s285_s15, 3  ;;  %s286_s18 = scalar_lea.sflag [#allocation6], %s285_s15 }
  0x2b   : > { %s289_s19 = scalar_lea.vmem [#allocation5], %s1938_s17 }
  0x2c   : > { %1783 = dma.done.wait (%p1907_p12), %s286_s18, 128  }
  0x2d   : > { %1785 = vsyncadd (%p1907_p12), %s286_s18, 4294967168  ;;  %p334_p4 = scmp.lt.s32.totalorder %s1878_s28, 1 }
  0x2f   : > { %s335_s29 = scalar_select %p334_p4, %s1878_s28, 1 }
  0x30   : > { %357 = sbr.rel (%p1480_p3) target bundleno = 56 (0x38), region = 56 }
  0x31   : > { %s1532_s20 = sshll.u32 %s335_s29, 5  ;;  %s1535_s25 = sshll.u32 %s335_s29, 6 }
  0x32   : > { %s338_s21 = scalar_lea.vmem %s2280_s1, %s1532_s20  ;;  %s1953_s8 = scalar_lea.vmem %s2281_s2, %s1532_s20 }
  0x33   : > { %s1958_s14 = scalar_lea.vmem %s2282_s3, %s1532_s20  ;;  %s1963_s16 = scalar_lea.vmem %s2283_s4, %s1535_s25 }
  0x35   : > { %v358_v0 = vld [vmem:[#allocation2] sm:$0xff]  ;;  %vm360_vm0 = vcmask 261120   ;;  %v359_v1 = vld [vmem:[#allocation2 + $0x8] sm:$0xff] }
  0x36   : > { %361 = vst.msk [vmem:[#allocation7] sm:$0xff] %vm360_vm0, %v358_v0 }
  0x37   : > { %362 = vst.msk [vmem:[#allocation7 + $0x8] sm:$0xff] %vm360_vm0, %v359_v1 }
  0x38 PF: > { %v369_v2 = vld [vmem:[%s338_s21 + $0x18] sm:$0xff]  ;;  %v368_v3 = vld [vmem:[%s338_s21 + $0x10] sm:$0xff]  ;;  %v367_v4 = vld [vmem:[%s338_s21 + $0x8] sm:$0xff]  ;;  %vm371_vm1 = vcmask 261120   ;;  %s1809_s15 = smov 104   ;;  %s1810_s18 = smov 120  }
  0x39   : > { %390 = vmatpush.msra.mxu0 %v369_v2  ;;  %v366_v5 = vld [vmem:[%s338_s21] sm:$0xff]  ;;  %v1977_v8 = vld [vmem:[%s289_s19] sm:$0xff]  ;;  %s1811_s29 = smov 112   ;;  %s1812_s20 = smov 96   ;;  %vm417_vm2 = vcmask 64512  }
  0x3a   : > { %v370_v9 = vperm.slane %v1977_v8, 0  ;;  %s1813_s25 = smov 64   ;;  %s1814_s26 = smov 16  }
  0x3b   : > { %391 = vmatpush.msra.mxu0 %v368_v3  ;;  %s1815_s27 = smov 8   ;;  %s1816_s21 = smov 24  }
  0x3c   : > { %s1819_s17 = smov [#allocation7]   ;;  %p1557_p1 = scmp.eq.s32.totalorder %s1878_s28, 1 }
  0x3d   : > { %392 = vmatpush.msra.mxu0 %v367_v4  ;;  %v1967_v6 = vld [vmem:[#allocation7] sm:$0xff]  ;;  %s1820_s24 = smov 128  }
  0x3e   : > { %v1971_v7 = vld [vmem:[#allocation7 + $0x8] sm:$0xff] }
  0x3f   : > { %393 = vmatpush.msra.mxu0 %v366_v5 }
  0x40   : > { %1496 = vmatmul.msk.f32.vlgmr.msra.gmra.mxu0 %vm371_vm1, %v1967_v6 }
  0x48   : > { %1497 = vmatmul.msk.f32.gmra.mxu0 %vm371_vm1, %v1971_v7 }
  0xbd   : > { %v395_v10 = vpop.f32.mrf.mxu0 }
  0xbe   : > { %v1980_v11 = vadd.f32 %v395_v10, %v370_v9 }
  0xc0   : > { %411 = vrot.lane.b32.xlu2 %v1980_v11, %s1809_s15  ;;  %403 = vrot.lane.b32.xlu0 %v1980_v11, %s1810_s18 }
  0xc5   : > { %v398_v12 = vpop.f32.mrf.mxu0 }
  0xc6   : > { %v1984_v13 = vadd.f32 %v398_v12, %v370_v9 }
  0xc8   : > { %405 = vrot.lane.b32.xlu1 %v1984_v13, %s1810_s18  ;;  %409 = vrot.lane.b32.xlu2 %v1984_v13, %s1811_s29 }
  0xc9   : > { %407 = vrot.lane.b32.xlu0 %v1980_v11, %s1811_s29 }
  0xd0   : > { %413 = vrot.lane.b32.xlu1 %v1984_v13, %s1809_s15 }
  0xd1   : > { %415 = vrot.lane.b32.xlu0 %v1980_v11, %s1812_s20 }
  0xd8   : > { %442 = vrot.lane.b32.xlu1 %v1984_v13, %s1812_s20 }
 0x11a   : > { %v1995_v15 = vpop.permute.xlu2 %411 }
 0x122   : > { %v2003_v18 = vpop.permute.xlu2 %409 }
 0x132   : > { %v1992_v14 = vpop.permute.xlu0 %403 }
 0x133   : > { %468 = vrot.lane.b32.xlu2 %v1992_v14, %s1812_s20  ;;  %v1606_v53 = vpack.i.bf16 %v1992_v14, %v1980_v11 }
 0x13a   : > { %v1997_v16 = vpop.permute.xlu1 %405 }
 0x13b   : > { %v1999_v17 = vpop.permute.xlu0 %407  ;;  %494 = vrot.lane.b32.xlu1 %v1997_v16, %s1812_s20 }
 0x13c   : > { %520 = vrot.lane.b32.xlu0 %v1999_v17, %s1812_s20  ;;  %v1611_v52 = vpack.i.bf16 %v1997_v16, %v1999_v17 }
 0x142   : > { %v2005_v19 = vpop.permute.xlu1 %413 }
 0x143   : > { %v416_v20 = vpop.permute.xlu0 %415  ;;  %546 = vrot.lane.b32.xlu1 %v2003_v18, %s1812_s20  ;;  %598 = vrot.lane.b32.xlu2 %v2005_v19, %s1812_s20 }
 0x144   : > { %572 = vrot.lane.b32.xlu0 %v1995_v15, %s1812_s20  ;;  %1498 = vmatpush.xpose.msk.msra.mxu2 %vm417_vm2, %v416_v20 }
 0x147   : > { %1499 = vmatmul.msk.f32.vlgmr.msra.gmra.mxu2 %vm417_vm2, %v1980_v11 }
 0x14a   : > { %v443_v21 = vpop.permute.xlu1 %442 }
 0x14b   : > { %1500 = vmatpush.xpose.msk.msrb.mxu2 %vm417_vm2, %v443_v21 }
 0x14f   : > { %1501 = vmatmul.msk.f32.vlgmr.msrb.gmra.mxu2 %vm417_vm2, %v1984_v13 }
 0x18d   : > { %v469_v22 = vpop.permute.xlu2 %468 }
 0x18e   : > { %1502 = vmatpush.xpose.msk.msra.mxu3 %vm417_vm2, %v469_v22 }
 0x191   : > { %1503 = vmatmul.msk.f32.vlgmr.msra.gmra.mxu3 %vm417_vm2, %v1992_v14 }
 0x19d   : > { %v599_v25 = vpop.permute.xlu2 %598 }
 0x1ad   : > { %v495_v23 = vpop.permute.xlu1 %494 }
 0x1ae   : > { %v521_v24 = vpop.permute.xlu0 %520  ;;  %1504 = vmatpush.xpose.msk.msra.mxu1 %vm417_vm2, %v495_v23 }
 0x1af   : > { %1506 = vmatpush.xpose.msk.msra.mxu2 %vm417_vm2, %v521_v24 }
 0x1b1   : > { %1505 = vmatmul.msk.f32.vlgmr.msra.gmra.mxu1 %vm417_vm2, %v1997_v16 }
 0x1b2   : > { %1507 = vmatmul.msk.f32.vlgmr.msra.gmra.mxu2 %vm417_vm2, %v1999_v17 }
 0x1b3   : > { %1512 = vmatpush.xpose.msk.msrb.mxu2 %vm417_vm2, %v599_v25 }
 0x1b5   : > { %v547_v26 = vpop.permute.xlu1 %546 }
 0x1b6   : > { %v573_v27 = vpop.permute.xlu0 %572  ;;  %1508 = vmatpush.xpose.msk.msrb.mxu3 %vm417_vm2, %v547_v26 }
 0x1b7   : > { %1510 = vmatpush.xpose.msk.msrb.mxu1 %vm417_vm2, %v573_v27 }
 0x1b9   : > { %1509 = vmatmul.msk.f32.vlgmr.msrb.gmra.mxu3 %vm417_vm2, %v2003_v18 }
 0x1ba   : > { %1511 = vmatmul.msk.f32.vlgmr.msrb.gmra.mxu1 %vm417_vm2, %v1995_v15  ;;  %1513 = vmatmul.msk.f32.vlgmr.msrb.gmra.mxu2 %vm417_vm2, %v2005_v19 }
 0x1ca   : > { %v439_v28 = vpop.f32.mrf.mxu2 }
 0x1cb   : > { %v624_v29 = vmul.f32 0.35355338, %v439_v28 }
 0x1cd   : > { %v632_v30 = vsel %vm417_vm2, %v624_v29, -inf }
 0x1ce   : > { %633 = vmax.xlane.f32.xlu2 %v632_v30 }
 0x1d2   : > { %v465_v34 = vpop.f32.mrf.mxu2 }
 0x1d3   : > { %v625_v38 = vmul.f32 0.35355338, %v465_v34 }
 0x1d5   : > { %v635_v44 = vsel %vm417_vm2, %v625_v38, -inf }
 0x214   : > { %v491_v31 = vpop.f32.mrf.mxu3 }
 0x215   : > { %v626_v32 = vmul.f32 0.35355338, %v491_v31 }
 0x217   : > { %v638_v33 = vsel %vm417_vm2, %v626_v32, -inf }
 0x218   : > { %639 = vmax.xlane.f32.xlu0 %v638_v33 }
 0x22e   : > { %v517_v35 = vpop.f32.mrf.mxu1 }
 0x22f   : > { %v627_v36 = vmul.f32 0.35355338, %v517_v35 }
 0x231   : > { %v641_v37 = vsel %vm417_vm2, %v627_v36, -inf }
 0x232   : > { %642 = vmax.xlane.f32.xlu2 %v641_v37 }
 0x235   : > { %v543_v39 = vpop.f32.mrf.mxu2 }
 0x236   : > { %v628_v40 = vmul.f32 0.35355338, %v543_v39 }
 0x237   : > { %v595_v41 = vpop.f32.mrf.mxu1 }
 0x238   : > { %v630_v42 = vmul.f32 0.35355338, %v595_v41  ;;  %v644_v43 = vsel %vm417_vm2, %v628_v40, -inf }
 0x239   : > { %645 = vmax.xlane.f32.xlu1 %v644_v43  ;;  %v1616_v43 = vpack.i.bf16 %v1995_v15, %v1984_v13 }
 0x23a   : > { %636 = vmax.xlane.f32.xlu2 %v635_v44  ;;  %v650_v45 = vsel %vm417_vm2, %v630_v42, -inf }
 0x23b   : > { %651 = vmax.xlane.f32.xlu0 %v650_v45 }
 0x23c   : > { %v569_v46 = vpop.f32.mrf.mxu3 }
 0x23d   : > { %v629_v47 = vmul.f32 0.35355338, %v569_v46  ;;  %v621_v48 = vpop.f32.mrf.mxu2 }
 0x23e   : > { %v631_v49 = vmul.f32 0.35355338, %v621_v48 }
 0x23f   : > { %v647_v51 = vsel %vm417_vm2, %v629_v47, -inf }
 0x240   : > { %v653_v50 = vsel %vm417_vm2, %v631_v49, -inf }
 0x241   : > { %654 = vmax.xlane.f32.xlu1 %v653_v50  ;;  %v634_v54 = vpop.xlane.xlu2 %633 }
 0x242   : > { %648 = vmax.xlane.f32.xlu2 %v647_v51  ;;  %v656_v55 = vsub.f32 %v624_v29, %v634_v54 }
 0x244   : > { %v664_v56 = vmul.f32 1.442695, %v656_v55 }
 0x246   : > { %1621 = vpow2.f32 %v664_v56 }
 0x24c   : > { %v2048_v57 = vpop.eup %1621 }
 0x24d   : > { %v680_v58 = vsel %vm417_vm2, %v2048_v57, 0.0 }
 0x24f   : > { %1612 = vrot.lane.b32.xlu0 %v1611_v52, %s1813_s25 }
 0x25a   : > { %1607 = vrot.lane.b32.xlu1 %v1606_v53, %s1813_s25 }
 0x279   : > { %681 = vadd.xlane.f32.xlu0 %v680_v58 }
 0x28b   : > { %v640_v63 = vpop.xlane.xlu0 %639 }
 0x28c   : > { %v658_v5 = vsub.f32 %v626_v32, %v640_v63 }
 0x28e   : > { %v668_v11 = vmul.f32 1.442695, %v658_v5 }
 0x2a5   : > { %v643_v59 = vpop.xlane.xlu2 %642 }
 0x2a6   : > { %v659_v60 = vsub.f32 %v627_v36, %v643_v59 }
 0x2a8   : > { %v670_v61 = vmul.f32 1.442695, %v659_v60 }
 0x2aa   : > { %1623 = vpow2.f32 %v670_v61 }
 0x2ac   : > { %v646_v62 = vpop.xlane.xlu1 %645 }
 0x2ad   : > { %v660_v0 = vsub.f32 %v628_v40, %v646_v62  ;;  %v637_v1 = vpop.xlane.xlu2 %636 }
 0x2ae   : > { %v657_v2 = vsub.f32 %v625_v38, %v637_v1  ;;  %v652_v14 = vpop.xlane.xlu0 %651 }
 0x2af   : > { %v672_v3 = vmul.f32 1.442695, %v660_v0  ;;  %v662_v24 = vsub.f32 %v630_v42, %v652_v14 }
 0x2b0   : > { %v2052_v4 = vpop.eup %1623  ;;  %v666_v9 = vmul.f32 1.442695, %v657_v2 }
 0x2b1   : > { %1625 = vpow2.f32 %v672_v3  ;;  %v689_v10 = vsel %vm417_vm2, %v2052_v4, 0.0  ;;  %v676_v28 = vmul.f32 1.442695, %v662_v24 }
 0x2b2   : > { %1627 = vpow2.f32 %v666_v9  ;;  %690 = vadd.xlane.f32.xlu0 %v689_v10 }
 0x2b3   : > { %1629 = vpow2.f32 %v668_v11 }
 0x2b4   : > { %v655_v12 = vpop.xlane.xlu1 %654 }
 0x2b5   : > { %v663_v16 = vsub.f32 %v631_v49, %v655_v12  ;;  %v649_v17 = vpop.xlane.xlu2 %648 }
 0x2b6   : > { %v661_v20 = vsub.f32 %v629_v47, %v649_v17 }
 0x2b7   : > { %v2056_v21 = vpop.eup %1625  ;;  %v678_v22 = vmul.f32 1.442695, %v663_v16 }
 0x2b8   : > { %v2058_v23 = vpop.eup %1627  ;;  %v674_v25 = vmul.f32 1.442695, %v661_v20  ;;  %v692_v26 = vsel %vm417_vm2, %v2056_v21, 0.0 }
 0x2b9   : > { %1631 = vpow2.f32 %v678_v22  ;;  %693 = vadd.xlane.f32.xlu2 %v692_v26  ;;  %v683_v27 = vsel %vm417_vm2, %v2058_v23, 0.0  ;;  %v2064_v29 = vpop.eup %1629 }
 0x2ba   : > { %1633 = vpow2.f32 %v674_v25  ;;  %684 = vadd.xlane.f32.xlu1 %v683_v27  ;;  %v686_v35 = vsel %vm417_vm2, %v2064_v29, 0.0 }
 0x2bb   : > { %1635 = vpow2.f32 %v676_v28 }
 0x2bf   : > { %v2066_v30 = vpop.eup %1631 }
 0x2c0   : > { %v2068_v31 = vpop.eup %1633  ;;  %v701_v32 = vsel %vm417_vm2, %v2066_v30, 0.0 }
 0x2c1   : > { %702 = vadd.xlane.f32.xlu0 %v701_v32  ;;  %v1613_v33 = vpop.permute.xlu0 %1612  ;;  %v695_v34 = vsel %vm417_vm2, %v2068_v31, 0.0  ;;  %v2076_v37 = vpop.eup %1635 }
 0x2c2   : > { %v1615_v36 = vunpack.i.h.bf16 %v1613_v33  ;;  %696 = vadd.xlane.f32.xlu2 %v695_v34  ;;  %687 = vadd.xlane.f32.xlu1 %v686_v35  ;;  %v698_v38 = vsel %vm417_vm2, %v2076_v37, 0.0  ;;  %v1614_v42 = vunpack.i.l.bf16 %v1613_v33 }
 0x2c4   : > { %923 = vmatpush.msra.mxu2 %v1615_v36 }
 0x2ca   : > { %699 = vadd.xlane.f32.xlu2 %v698_v38 }
 0x2cc   : > { %v1608_v39 = vpop.permute.xlu1 %1607 }
 0x2cd   : > { %v1610_v40 = vunpack.i.h.bf16 %v1608_v39  ;;  %v1609_v41 = vunpack.i.l.bf16 %v1608_v39 }
 0x2cf   : > { %845 = vmatpush.msra.mxu3 %v1609_v41  ;;  %897 = vmatpush.msra.mxu1 %v1610_v40 }
 0x2d1   : > { %949 = vmatpush.msrb.mxu3 %v1614_v42 }
 0x2d5   : > { %954 = vrot.lane.b32.xlu0 %v2003_v18, %s1813_s25 }
 0x2db   : > { %1006 = vrot.lane.b32.xlu1 %v2005_v19, %s1813_s25 }
 0x2e2   : > { %1617 = vrot.lane.b32.xlu2 %v1616_v43, %s1813_s25  ;;  %v1066_v43 = vld [vmem:[%s1953_s8 + $0x10] sm:$0xff] }
 0x2ec   : > { %v682_v44 = vpop.xlane.xlu0 %681 }
 0x2ed   : > { %1637 = vrcp.f32 %v682_v44  ;;  %v715_v48 = vand.u32 2147483648, %v682_v44  ;;  %v713_v50 = vand.u32 2147483647, %v682_v44  ;;  %vm709_vm4 = vweird.f32 %v682_v44 }
 0x2ef   : > { %v716_v18 = vor.u32 1.1754944e-38, %v715_v48  ;;  %vm714_vm6 = vcmp.eq.f32.partialorder %v713_v50, 8.507059e+37 }
 0x2f3   : > { %v1638_v45 = vpop.eup %1637 }
 0x2f4   : > { %v705_v46 = vmul.f32 %v1638_v45, %v682_v44  ;;  %vm710_vm3 = vweird.f32 %v1638_v45 }
 0x2f5   : > { %vm711_vm5 = vmor %vm709_vm4, %vm710_vm3 }
 0x2f6   : > { %v706_v47 = vsub.f32 1.0, %v705_v46 }
 0x2f8   : > { %v707_v49 = vmul.f32 %v1638_v45, %v706_v47 }
 0x2fa   : > { %v708_v51 = vadd.f32 %v1638_v45, %v707_v49 }
 0x2fc   : > { %v712_v52 = vsel %vm711_vm5, %v1638_v45, %v708_v51  ;;  %v1064_v45 = vld [vmem:[%s1953_s8] sm:$0xff] }
 0x2fd   : > { %v717_v19 = vsel %vm714_vm6, %v716_v18, %v712_v52 }
 0x2fe   : > { %v816_v13 = vmul.f32 %v2048_v57, %v717_v19 }
 0x300   : > { %1514 = vmatmul.msk.f32.vlgmr.msra.gmra.mxu3 %vm417_vm2, %v816_v13 }
 0x325   : > { %v691_v15 = vpop.xlane.xlu0 %690 }
 0x326   : > { %1639 = vrcp.f32 %v691_v15  ;;  %v757_v60 = vand.u32 2147483648, %v691_v15  ;;  %vm751_vm8 = vweird.f32 %v691_v15  ;;  %v755_v63 = vand.u32 2147483647, %v691_v15 }
 0x328   : > { %v758_v9 = vor.u32 1.1754944e-38, %v757_v60  ;;  %vm756_vm10 = vcmp.eq.f32.partialorder %v755_v63, 8.507059e+37  ;;  %v1817_v63 = vmov 32.0  }
 0x32c   : > { %v1640_v53 = vpop.eup %1639  ;;  %v694_v54 = vpop.xlane.xlu2 %693 }
 0x32d   : > { %v747_v55 = vmul.f32 %v1640_v53, %v691_v15  ;;  %1641 = vrcp.f32 %v694_v54  ;;  %v685_v56 = vpop.xlane.xlu1 %684  ;;  %vm752_vm7 = vweird.f32 %v1640_v53  ;;  %v771_v12 = vand.u32 2147483648, %v694_v54 }
 0x32e   : > { %1643 = vrcp.f32 %v685_v56  ;;  %vm753_vm9 = vmor %vm751_vm8, %vm752_vm7  ;;  %v769_v20 = vand.u32 2147483647, %v694_v54  ;;  %vm765_vm12 = vweird.f32 %v694_v54  ;;  %v727_v27 = vand.u32 2147483647, %v685_v56 }
 0x32f   : > { %v748_v58 = vsub.f32 1.0, %v747_v55  ;;  %v772_v26 = vor.u32 1.1754944e-38, %v771_v12  ;;  %v729_v33 = vand.u32 2147483648, %v685_v56  ;;  %vm723_vm0 = vweird.f32 %v685_v56 }
 0x330   : > { %vm770_vm14 = vcmp.eq.f32.partialorder %v769_v20, 8.507059e+37  ;;  %vm2118_vm3 = vcmp.eq.f32.partialorder %v727_v27, 8.507059e+37 }
 0x331   : > { %v749_v59 = vmul.f32 %v1640_v53, %v748_v58  ;;  %v730_v46 = vor.u32 1.1754944e-38, %v729_v33 }
 0x333   : > { %v1642_v61 = vpop.eup %1641  ;;  %v750_v62 = vadd.f32 %v1640_v53, %v749_v59 }
 0x334   : > { %v2089_v0 = vpop.eup %1643  ;;  %v761_v57 = vmul.f32 %v1642_v61, %v694_v54  ;;  %v2091_v1 = vpop.xlane.xlu0 %702  ;;  %vm766_vm11 = vweird.f32 %v1642_v61 }
 0x335   : > { %v754_v2 = vsel %vm753_vm9, %v1640_v53, %v750_v62  ;;  %v719_v3 = vmul.f32 %v2089_v0, %v685_v56  ;;  %1645 = vrcp.f32 %v2091_v1  ;;  %v2095_v5 = vpop.xlane.xlu2 %696  ;;  %v2097_v11 = vpop.xlane.xlu1 %687  ;;  %vm767_vm13 = vmor %vm765_vm12, %vm766_vm11  ;;  %vm724_vm15 = vweird.f32 %v2089_v0 }
 0x336   : > { %v762_v10 = vsub.f32 1.0, %v761_v57  ;;  %1647 = vrcp.f32 %v2095_v5  ;;  %v759_v16 = vsel %vm756_vm10, %v758_v9, %v754_v2  ;;  %vm2123_vm4 = vmor %vm723_vm0, %vm724_vm15  ;;  %vm807_vm5 = vweird.f32 %v2091_v1 }
 0x337   : > { %v720_v14 = vsub.f32 1.0, %v719_v3  ;;  %1649 = vrcp.f32 %v2097_v11  ;;  %v819_v28 = vmul.f32 %v2052_v4, %v759_v16  ;;  %v811_v4 = vand.u32 2147483647, %v2091_v1 }
 0x338   : > { %v763_v17 = vmul.f32 %v1642_v61, %v762_v10  ;;  %v813_v50 = vand.u32 2147483648, %v2091_v1  ;;  %vm779_vm6 = vweird.f32 %v2095_v5  ;;  %v783_v52 = vand.u32 2147483647, %v2095_v5 }
 0x339   : > { %v721_v22 = vmul.f32 %v2089_v0, %v720_v14  ;;  %1517 = vmatmul.msk.f32.vlgmr.msra.gmra.mxu2 %vm417_vm2, %v819_v28  ;;  %vm2136_vm7 = vcmp.eq.f32.partialorder %v811_v4, 8.507059e+37  ;;  %v785_v15 = vand.u32 2147483648, %v2095_v5  ;;  %v743_v53 = vand.u32 2147483648, %v2097_v11 }
 0x33a   : > { %v764_v24 = vadd.f32 %v1642_v61, %v763_v17  ;;  %v741_v56 = vand.u32 2147483647, %v2097_v11  ;;  %v814_v59 = vor.u32 1.1754944e-38, %v813_v50  ;;  %vm737_vm12 = vweird.f32 %v2097_v11 }
 0x33b   : > { %v2102_v25 = vpop.eup %1645  ;;  %v722_v38 = vadd.f32 %v2089_v0, %v721_v22  ;;  %v744_v9 = vor.u32 1.1754944e-38, %v743_v53  ;;  %v1068_v53 = vperm.slane %v1977_v8, 1 }
 0x33c   : > { %v768_v32 = vsel %vm767_vm13, %v1642_v61, %v764_v24  ;;  %v803_v34 = vmul.f32 %v2102_v25, %v2091_v1  ;;  %v2107_v35 = vpop.eup %1647  ;;  %vm808_vm8 = vweird.f32 %v2102_v25  ;;  %vm742_vm15 = vcmp.eq.f32.partialorder %v741_v56, 8.507059e+37 }
 0x33d   : > { %v773_v36 = vsel %vm770_vm14, %v772_v26, %v768_v32  ;;  %v2112_v39 = vpop.xlane.xlu2 %699  ;;  %v775_v41 = vmul.f32 %v2107_v35, %v2095_v5  ;;  %v1650_v42 = vpop.eup %1649  ;;  %vm780_vm10 = vweird.f32 %v2107_v35  ;;  %vm2154_vm11 = vmor %vm807_vm5, %vm808_vm8  ;;  %v786_v24 = vor.u32 1.1754944e-38, %v785_v15 }
 0x33e   : > { %v804_v40 = vsub.f32 1.0, %v803_v34  ;;  %1651 = vrcp.f32 %v2112_v39  ;;  %v820_v44 = vmul.f32 %v2056_v21, %v773_v36  ;;  %v733_v49 = vmul.f32 %v1650_v42, %v2097_v11  ;;  %vm2165_vm14 = vmor %vm779_vm6, %vm780_vm10 }
 0x33f   : > { %v776_v48 = vsub.f32 1.0, %v775_v41  ;;  %v726_v21 = vsel %vm2123_vm4, %v2089_v0, %v722_v38  ;;  %vm738_vm9 = vweird.f32 %v1650_v42  ;;  %v797_v11 = vand.u32 2147483647, %v2112_v39 }
 0x340   : > { %v805_v47 = vmul.f32 %v2102_v25, %v804_v40  ;;  %1518 = vmatmul.msk.f32.vlgmr.msrb.gmra.mxu3 %vm417_vm2, %v820_v44  ;;  %v734_v19 = vsub.f32 1.0, %v733_v49  ;;  %v731_v58 = vsel %vm2118_vm3, %v730_v46, %v726_v21  ;;  %vm739_vm13 = vmor %vm737_vm12, %vm738_vm9  ;;  %v799_v16 = vand.u32 2147483648, %v2112_v39  ;;  %v1065_v44 = vld [vmem:[%s1953_s8 + $0x8] sm:$0xff] }
 0x341   : > { %v777_v18 = vmul.f32 %v2107_v35, %v776_v48  ;;  %v817_v12 = vmul.f32 %v2058_v23, %v731_v58  ;;  %vm784_vm3 = vcmp.eq.f32.partialorder %v783_v52, 8.507059e+37  ;;  %vm793_vm4 = vweird.f32 %v2112_v39 }
 0x342   : > { %v806_v13 = vadd.f32 %v2102_v25, %v805_v47  ;;  %v735_v55 = vmul.f32 %v1650_v42, %v734_v19  ;;  %v800_v28 = vor.u32 1.1754944e-38, %v799_v16  ;;  %vm798_vm6 = vcmp.eq.f32.partialorder %v797_v11, 8.507059e+37 }
 0x343   : > { %v778_v60 = vadd.f32 %v2107_v35, %v777_v18  ;;  %vm1061_vm8 = vcmask 195584   ;;  %1653 = vrcp.f32 %v1817_v63 }
 0x344   : > { %v1652_v54 = vpop.eup %1651  ;;  %v736_v0 = vadd.f32 %v1650_v42, %v735_v55  ;;  %v810_v3 = vsel %vm2154_vm11, %v2102_v25, %v806_v13 }
 0x345   : > { %v789_v61 = vmul.f32 %v1652_v54, %v2112_v39  ;;  %v1618_v62 = vpop.permute.xlu2 %1617  ;;  %v782_v17 = vsel %vm2165_vm14, %v2107_v35, %v778_v60  ;;  %vm794_vm0 = vweird.f32 %v1652_v54  ;;  %v815_v22 = vsel %vm2136_vm7, %v814_v59, %v810_v3 }
 0x346   : > { %v1620_v57 = vunpack.i.h.bf16 %v1618_v62  ;;  %v1619_v2 = vunpack.i.l.bf16 %v1618_v62  ;;  %v740_v14 = vsel %vm739_vm13, %v1650_v42, %v736_v0  ;;  %v787_v27 = vsel %vm784_vm3, %v786_v24, %v782_v17  ;;  %vm795_vm5 = vmor %vm793_vm4, %vm794_vm0  ;;  %v1067_v42 = vld [vmem:[%s1953_s8 + $0x18] sm:$0xff]  ;;  %s1364_s8 = sshll.u32 %s2285_s6, 4  ;;  %s1365_s8 = int_to_ptr.hbm [resolvable:$true] %s1364_s8 }
 0x347   : > { %v790_v10 = vsub.f32 1.0, %v789_v61  ;;  %v745_v20 = vsel %vm742_vm15, %v744_v9, %v740_v14  ;;  %v955_v5 = vpop.permute.xlu0 %954  ;;  %v823_v34 = vmul.f32 %v2066_v30, %v815_v22  ;;  %1087 = vmatpush.msra.mxu3 %v1067_v42  ;;  %vm1058_vm7 = vcmask 130048  }
 0x348   : > { %871 = vmatpush.msrb.mxu0 %v1619_v2  ;;  %1001 = vmatpush.msrb.mxu1 %v1620_v57  ;;  %v818_v25 = vmul.f32 %v2064_v29, %v745_v20  ;;  %v821_v29 = vmul.f32 %v2068_v31, %v787_v27 }
 0x349   : > { %v791_v23 = vmul.f32 %v1652_v54, %v790_v10  ;;  %1515 = vmatmul.msk.f32.vlgmr.msrb.gmra.mxu0 %vm417_vm2, %v817_v12  ;;  %1088 = vmatpush.msra.mxu3 %v1066_v43  ;;  %v1654_v0 = vpop.eup %1653 }
 0x34a   : > { %975 = vmatpush.msra.mxu0 %v955_v5  ;;  %1516 = vmatmul.msk.f32.vlgmr.msra.gmra.mxu1 %vm417_vm2, %v818_v25  ;;  %v1107_v57 = vmul.f32 32.0, %v1654_v0  ;;  %v1818_v5 = vmov 31.0  }
 0x34b   : > { %v792_v26 = vadd.f32 %v1652_v54, %v791_v23  ;;  %1089 = vmatpush.msra.mxu3 %v1065_v44  ;;  %1655 = vrcp.f32 %v1818_v5 }
 0x34c   : > { %v1108_v2 = vsub.f32 1.0, %v1107_v57 }
 0x34d   : > { %v796_v32 = vsel %vm795_vm5, %v1652_v54, %v792_v26  ;;  %v1007_v33 = vpop.permute.xlu1 %1006  ;;  %1090 = vmatpush.msra.mxu3 %v1064_v45 }
 0x34e   : > { %v801_v35 = vsel %vm798_vm6, %v800_v28, %v796_v32  ;;  %1027 = vmatpush.msrb.mxu2 %v1007_v33  ;;  %v1109_v3 = vmul.f32 %v1654_v0, %v1108_v2  ;;  %v1199_v32 = vld [vmem:[%s1958_s14 + $0x18] sm:$0xff]  ;;  %v1198_v33 = vld [vmem:[%s1958_s14 + $0x10] sm:$0xff] }
 0x34f   : > { %1521 = vmatmul.msk.f32.vlgmr.msrb.gmra.mxu2 %vm417_vm2, %v823_v34  ;;  %v822_v36 = vmul.f32 %v2076_v37, %v801_v35  ;;  %1219 = vmatpush.msrb.mxu0 %v1199_v32  ;;  %v1197_v35 = vld [vmem:[%s1958_s14 + $0x8] sm:$0xff] }
 0x350   : > { %v1110_v9 = vadd.f32 %v1654_v0, %v1109_v3 }
 0x351   : > { %1519 = vmatmul.msk.f32.vlgmr.msra.gmra.mxu0 %vm417_vm2, %v821_v29  ;;  %v1656_v22 = vpop.eup %1655 }
 0x352   : > { %1520 = vmatmul.msk.f32.vlgmr.msrb.gmra.mxu1 %vm417_vm2, %v822_v36  ;;  %v1126_v24 = vmul.f32 31.0, %v1656_v22  ;;  %vm1130_vm9 = vweird.f32 %v1656_v22  ;;  %1220 = vmatpush.msrb.mxu0 %v1198_v33  ;;  %v1196_v36 = vld [vmem:[%s1958_s14] sm:$0xff] }
 0x354   : > { %v1127_v25 = vsub.f32 1.0, %v1126_v24  ;;  %1221 = vmatpush.msrb.mxu0 %v1197_v35  ;;  %v1234_v35 = vld [vmem:[%s1963_s16 + $0x10] sm:$0xff] }
 0x356   : > { %v1128_v26 = vmul.f32 %v1656_v22, %v1127_v25  ;;  %1222 = vmatpush.msrb.mxu0 %v1196_v36  ;;  %v1232_v36 = vld [vmem:[%s1963_s16] sm:$0xff] }
 0x358   : > { %v1129_v27 = vadd.f32 %v1656_v22, %v1128_v26 }
 0x35a   : > { %v2215_v28 = vsel %vm1130_vm9, %v1656_v22, %v1129_v27 }
 0x383   : > { %v847_v38 = vpop.f32.mrf.mxu3 }
 0x3bc   : > { %v925_v37 = vpop.f32.mrf.mxu2 }
 0x3c3   : > { %v951_v39 = vpop.f32.mrf.mxu3 }
 0x3c4   : > { %1042 = vrot.lane.b32.xlu0 %v951_v39, %s1814_s26 }
 0x3c6   : > { %v873_v40 = vpop.f32.mrf.mxu0 }
 0x3c7   : > { %v899_v30 = vpop.f32.mrf.mxu1 }
 0x3c8   : > { %1034 = vrot.lane.b32.xlu1 %v899_v30, %s1815_s27 }
 0x3ce   : > { %v977_v31 = vpop.f32.mrf.mxu0 }
 0x3cf   : > { %1044 = vrot.lane.b32.xlu0 %v977_v31, %s1814_s26  ;;  %v1003_v4 = vpop.f32.mrf.mxu1 }
 0x3d0   : > { %1050 = vrot.lane.b32.xlu2 %v1003_v4, %s1816_s21  ;;  %1036 = vrot.lane.b32.xlu1 %v925_v37, %s1815_s27 }
 0x3d2   : > { %v1029_v41 = vpop.f32.mrf.mxu2 }
 0x3d8   : > { %1052 = vrot.lane.b32.xlu2 %v1029_v41, %s1816_s21 }
 0x42a   : > { %v1051_v47 = vpop.permute.xlu2 %1050 }
 0x432   : > { %v1053_v19 = vpop.permute.xlu2 %1052 }
 0x436   : > { %v1043_v46 = vpop.permute.xlu0 %1042 }
 0x43a   : > { %v1035_v48 = vpop.permute.xlu1 %1034 }
 0x43b   : > { %v1056_v49 = vsel %vm417_vm2, %v847_v38, %v1035_v48 }
 0x43c   : > { %v1059_v50 = vsel %vm1058_vm7, %v1056_v49, %v1043_v46 }
 0x43d   : > { %v1062_v21 = vsel %vm1061_vm8, %v1059_v50, %v1051_v47 }
 0x43e   : > { %1522 = vmatmul.msk.f32.vlgmr.msra.gmra.mxu3 %vm371_vm1, %v1062_v21 }
 0x441   : > { %v1045_v51 = vpop.permute.xlu0 %1044 }
 0x442   : > { %v1037_v18 = vpop.permute.xlu1 %1036 }
 0x443   : > { %v1057_v52 = vsel %vm417_vm2, %v873_v40, %v1037_v18  ;;  %vm1111_vm2 = vweird.f32 %v1654_v0  ;;  %v1238_v18 = vld [vmem:[%s1963_s16 + $0x30] sm:$0xff] }
 0x444   : > { %v1060_v13 = vsel %vm1058_vm7, %v1057_v52, %v1045_v51  ;;  %v2201_v10 = vsel %vm1111_vm2, %v1654_v0, %v1110_v9  ;;  %v1239_v51 = vld [vmem:[%s1963_s16 + $0x38] sm:$0xff] }
 0x445   : > { %v1063_v15 = vsel %vm1061_vm8, %v1060_v13, %v1053_v19  ;;  %1256 = vmatpush.msra.mxu1 %v1239_v51  ;;  %v1237_v19 = vld [vmem:[%s1963_s16 + $0x28] sm:$0xff]  ;;  %vm1241_vm8 = vcmask 523264  }
 0x446   : > { %1523 = vmatmul.msk.f32.gmra.mxu3 %vm371_vm1, %v1063_v15 }
 0x447   : > { %1257 = vmatpush.msra.mxu1 %v1238_v18 }
 0x449   : > { %1258 = vmatpush.msra.mxu1 %v1237_v19 }
 0x4c1   : > { %v1092_v54 = vpop.f32.mrf.mxu3 }
 0x4c2   : > { %v1093_v55 = vadd.f32 %v1092_v54, %v1068_v53 }
 0x4c4   : > { %v1098_v56 = vadd.f32 %v1093_v55, %v1967_v6 }
 0x4c6   : > { %v1100_v58 = vsel %vm371_vm1, %v1098_v56, 0.0 }
 0x4c7   : > { %1101 = vadd.xlane.f32.xlu1 %v1100_v58 }
 0x4c9   : > { %v1095_v59 = vpop.f32.mrf.mxu3 }
 0x4ca   : > { %v1096_v60 = vadd.f32 %v1095_v59, %v1068_v53  ;;  %v1236_v53 = vld [vmem:[%s1963_s16 + $0x20] sm:$0xff] }
 0x4cb   : > { %1259 = vmatpush.msra.mxu1 %v1236_v53 }
 0x4cc   : > { %v1099_v61 = vadd.f32 %v1096_v60, %v1971_v7 }
 0x4ce   : > { %v1103_v62 = vsel %vm371_vm1, %v1099_v61, 0.0 }
 0x4cf   : > { %1104 = vadd.xlane.f32.xlu0 %v1103_v62 }
 0x53a   : > { %v1102_v6 = vpop.xlane.xlu1 %1101 }
 0x53b   : > { %v1113_v12 = vmul.f32 %v2201_v10, %v1102_v6  ;;  %v1190_v6 = vperm.slane %v1977_v8, 2 }
 0x53d   : > { %v2204_v1 = vsub.f32 %v1098_v56, %v1113_v12  ;;  %v1235_v56 = vld [vmem:[%s1963_s16 + $0x18] sm:$0xff] }
 0x53e   : > { %1260 = vmatpush.msra.mxu1 %v1235_v56 }
 0x53f   : > { %v1117_v7 = vmul.f32 %v2204_v1, %v2204_v1 }
 0x540   : > { %1261 = vmatpush.msra.mxu1 %v1234_v35 }
 0x541   : > { %v1119_v14 = vsel %vm371_vm1, %v1117_v7, 0.0 }
 0x542   : > { %1120 = vadd.xlane.f32.xlu2 %v1119_v14  ;;  %v1105_v11 = vpop.xlane.xlu0 %1104 }
 0x543   : > { %v1114_v16 = vmul.f32 %v2201_v10, %v1105_v11  ;;  %v1193_v11 = vperm.slane %v1977_v8, 3 }
 0x545   : > { %v2210_v17 = vsub.f32 %v1099_v61, %v1114_v16 }
 0x547   : > { %v1118_v20 = vmul.f32 %v2210_v17, %v2210_v17 }
 0x549   : > { %v1122_v23 = vsel %vm371_vm1, %v1118_v20, 0.0 }
 0x54a   : > { %1123 = vadd.xlane.f32.xlu1 %v1122_v23 }
 0x5b5   : > { %v1121_v34 = vpop.xlane.xlu2 %1120 }
 0x5b6   : > { %v1132_v29 = vmul.f32 %v2215_v28, %v1121_v34 }
 0x5b8   : > { %1657 = vrsqrt.f32 %v1132_v29  ;;  %vm1141_vm10 = vcmp.eq.f32.partialorder %v1132_v29, inf  ;;  %v1144_v46 = vand.u32 2147483648, %v1132_v29  ;;  %vm1143_vm11 = vcmp.eq.f32.partialorder %v1132_v29, 0.0 }
 0x5bd   : > { %v1124_v38 = vpop.xlane.xlu1 %1123 }
 0x5be   : > { %v1658_v39 = vpop.eup %1657  ;;  %v1133_v40 = vmul.f32 %v2215_v28, %v1124_v38  ;;  %v1200_v38 = vperm.slane %v1977_v8, 4 }
 0x5bf   : > { %v1135_v30 = vmul.f32 %v1658_v39, %v1132_v29 }
 0x5c0   : > { %1659 = vrsqrt.f32 %v1133_v40  ;;  %vm1153_vm12 = vcmp.eq.f32.partialorder %v1133_v40, inf  ;;  %v1156_v15 = vand.u32 2147483648, %v1133_v40  ;;  %vm1155_vm13 = vcmp.eq.f32.partialorder %v1133_v40, 0.0 }
 0x5c1   : > { %v1136_v31 = vmul.f32 %v1658_v39, %v1135_v30 }
 0x5c3   : > { %v1137_v37 = vmul.f32 0.5, %v1136_v31 }
 0x5c5   : > { %v1138_v4 = vsub.f32 1.5, %v1137_v37 }
 0x5c6   : > { %v1660_v41 = vpop.eup %1659 }
 0x5c7   : > { %v1139_v42 = vmul.f32 %v1658_v39, %v1138_v4  ;;  %v1147_v43 = vmul.f32 %v1660_v41, %v1133_v40  ;;  %v1240_v4 = vperm.slane %v1977_v8, 5 }
 0x5c9   : > { %v1140_v44 = vmul.f32 %v1139_v42, %v1132_v29  ;;  %v1148_v45 = vmul.f32 %v1660_v41, %v1147_v43 }
 0x5cb   : > { %v1142_v47 = vsel %vm1141_vm10, %v1132_v29, %v1140_v44  ;;  %v1149_v48 = vmul.f32 0.5, %v1148_v45  ;;  %v1233_v29 = vld [vmem:[%s1963_s16 + $0x8] sm:$0xff] }
 0x5cc   : > { %v1145_v49 = vsel %vm1143_vm11, %v1144_v46, %v1142_v47  ;;  %1262 = vmatpush.msra.mxu1 %v1233_v29 }
 0x5cd   : > { %v1158_v50 = vadd.f32 1e-06, %v1145_v49  ;;  %v1150_v21 = vsub.f32 1.5, %v1149_v48 }
 0x5ce   : > { %1263 = vmatpush.msra.mxu1 %v1232_v36  ;;  %v1673_v36 = vld [vmem:[%s289_s19] sm:$0xff]  ;;  %s1362_s19 = sshll.u32 %s1819_s17, 4  ;;  %s1363_s19 = int_to_ptr.vmem [resolvable:$true] %s1362_s19 }
 0x5cf   : > { %1661 = vrcp.f32 %v1158_v50  ;;  %v1151_v52 = vmul.f32 %v1660_v41, %v1150_v21  ;;  %v1171_v62 = vand.u32 2147483648, %v1158_v50  ;;  %v1169_v0 = vand.u32 2147483647, %v1158_v50 }
 0x5d0   : > { %vm1165_vm15 = vweird.f32 %v1158_v50 }
 0x5d1   : > { %v1152_v13 = vmul.f32 %v1151_v52, %v1133_v40  ;;  %v1172_v3 = vor.u32 1.1754944e-38, %v1171_v62  ;;  %vm1170_vm3 = vcmp.eq.f32.partialorder %v1169_v0, 8.507059e+37 }
 0x5d3   : > { %v1154_v54 = vsel %vm1153_vm12, %v1133_v40, %v1152_v13 }
 0x5d4   : > { %v1157_v55 = vsel %vm1155_vm13, %v1156_v15, %v1154_v54 }
 0x5d5   : > { %v1662_v58 = vpop.eup %1661  ;;  %v1159_v59 = vadd.f32 1e-06, %v1157_v55 }
 0x5d6   : > { %v1161_v60 = vmul.f32 %v1662_v58, %v1158_v50  ;;  %vm1166_vm14 = vweird.f32 %v1662_v58 }
 0x5d7   : > { %1663 = vrcp.f32 %v1159_v59  ;;  %vm1167_vm0 = vmor %vm1165_vm15, %vm1166_vm14  ;;  %v1185_v20 = vand.u32 2147483648, %v1159_v59  ;;  %v1183_v22 = vand.u32 2147483647, %v1159_v59  ;;  %vm1179_vm5 = vweird.f32 %v1159_v59 }
 0x5d8   : > { %v1162_v61 = vsub.f32 1.0, %v1161_v60 }
 0x5d9   : > { %v1186_v26 = vor.u32 1.1754944e-38, %v1185_v20  ;;  %vm1184_vm7 = vcmp.eq.f32.partialorder %v1183_v22, 8.507059e+37 }
 0x5da   : > { %v1163_v63 = vmul.f32 %v1662_v58, %v1162_v61 }
 0x5dc   : > { %v1164_v57 = vadd.f32 %v1662_v58, %v1163_v63 }
 0x5dd   : > { %v1664_v2 = vpop.eup %1663 }
 0x5de   : > { %v1168_v9 = vsel %vm1167_vm0, %v1662_v58, %v1164_v57  ;;  %v1175_v12 = vmul.f32 %v1664_v2, %v1159_v59  ;;  %vm1180_vm4 = vweird.f32 %v1664_v2 }
 0x5df   : > { %v1173_v7 = vsel %vm1170_vm3, %v1172_v3, %v1168_v9  ;;  %vm1181_vm6 = vmor %vm1179_vm5, %vm1180_vm4 }
 0x5e0   : > { %v1188_v14 = vmul.f32 %v1173_v7, %v2204_v1  ;;  %v1176_v16 = vsub.f32 1.0, %v1175_v12 }
 0x5e2   : > { %v1191_v23 = vmul.f32 %v1190_v6, %v1188_v14  ;;  %v1177_v5 = vmul.f32 %v1664_v2, %v1176_v16 }
 0x5e4   : > { %v1194_v24 = vadd.f32 %v1193_v11, %v1191_v23  ;;  %v1178_v25 = vadd.f32 %v1664_v2, %v1177_v5 }
 0x5e6   : > { %1524 = vmatmul.msk.f32.vlgmr.msrb.gmra.mxu0 %vm371_vm1, %v1194_v24  ;;  %v1182_v27 = vsel %vm1181_vm6, %v1664_v2, %v1178_v25 }
 0x5e7   : > { %v1187_v1 = vsel %vm1184_vm7, %v1186_v26, %v1182_v27 }
 0x5e8   : > { %v1189_v32 = vmul.f32 %v1187_v1, %v2210_v17 }
 0x5ea   : > { %v1192_v33 = vmul.f32 %v1190_v6, %v1189_v32 }
 0x5ec   : > { %v1195_v34 = vadd.f32 %v1193_v11, %v1192_v33 }
 0x5ee   : > { %1525 = vmatmul.msk.f32.gmra.mxu0 %vm371_vm1, %v1195_v34 }
 0x663   : > { %v1224_v39 = vpop.f32.mrf.mxu0 }
 0x664   : > { %v1225_v40 = vadd.f32 %v1224_v39, %v1200_v38 }
 0x666   : > { %v1230_v30 = vmax.f32 %v1225_v40, 0.0 }
 0x668   : > { %1526 = vmatmul.msk.f32.vlgmr.msra.gmra.mxu1 %vm1241_vm8, %v1230_v30 }
 0x66b   : > { %v1227_v31 = vpop.f32.mrf.mxu0 }
 0x66c   : > { %v1228_v37 = vadd.f32 %v1227_v31, %v1200_v38  ;;  %v1349_v38 = vperm.slane %v1673_v36, 6  ;;  %v1352_v31 = vperm.slane %v1673_v36, 7 }
 0x66e   : > { %v1231_v17 = vmax.f32 %v1228_v37, 0.0 }
 0x670   : > { %1527 = vmatmul.msk.f32.gmra.mxu1 %vm1241_vm8, %v1231_v17 }
 0x6e5   : > { %v1265_v41 = vpop.f32.mrf.mxu1 }
 0x6e6   : > { %v1266_v42 = vadd.f32 %v1265_v41, %v1240_v4 }
 0x6e8   : > { %v1271_v43 = vadd.f32 %v1266_v42, %v1194_v24 }
 0x6ea   : > { %v1273_v44 = vsel %vm371_vm1, %v1271_v43, 0.0 }
 0x6eb   : > { %1274 = vadd.xlane.f32.xlu0 %v1273_v44 }
 0x6ed   : > { %v1268_v45 = vpop.f32.mrf.mxu1 }
 0x6ee   : > { %v1269_v46 = vadd.f32 %v1268_v45, %v1240_v4 }
 0x6f0   : > { %v1272_v47 = vadd.f32 %v1269_v46, %v1195_v34 }
 0x6f2   : > { %v1276_v48 = vsel %vm371_vm1, %v1272_v47, 0.0 }
 0x6f3   : > { %1277 = vadd.xlane.f32.xlu2 %v1276_v48 }
 0x75e   : > { %v1275_v49 = vpop.xlane.xlu0 %1274 }
 0x75f   : > { %v1279_v50 = vmul.f32 %v1275_v49, %v2201_v10 }
 0x761   : > { %v2242_v21 = vsub.f32 %v1271_v43, %v1279_v50 }
 0x763   : > { %v1283_v8 = vmul.f32 %v2242_v21, %v2242_v21 }
 0x765   : > { %v1285_v51 = vsel %vm371_vm1, %v1283_v8, 0.0 }
 0x766   : > { %v1278_v18 = vpop.xlane.xlu2 %1277  ;;  %1286 = vadd.xlane.f32.xlu1 %v1285_v51 }
 0x767   : > { %v1280_v52 = vmul.f32 %v1278_v18, %v2201_v10 }
 0x769   : > { %v2248_v19 = vsub.f32 %v1272_v47, %v1280_v52 }
 0x76b   : > { %v1284_v13 = vmul.f32 %v2248_v19, %v2248_v19 }
 0x76d   : > { %v1288_v15 = vsel %vm371_vm1, %v1284_v13, 0.0 }
 0x76e   : > { %1289 = vadd.xlane.f32.xlu0 %v1288_v15 }
 0x7d9   : > { %v1287_v53 = vpop.xlane.xlu1 %1286 }
 0x7da   : > { %v1291_v54 = vmul.f32 %v1287_v53, %v2215_v28 }
 0x7dc   : > { %1665 = vrsqrt.f32 %v1291_v54  ;;  %vm1300_vm2 = vcmp.eq.f32.partialorder %v1291_v54, inf  ;;  %v1303_v3 = vand.u32 2147483648, %v1291_v54  ;;  %vm1302_vm9 = vcmp.eq.f32.partialorder %v1291_v54, 0.0 }
 0x7e1   : > { %v1290_v55 = vpop.xlane.xlu0 %1289 }
 0x7e2   : > { %v1666_v56 = vpop.eup %1665  ;;  %v1292_v58 = vmul.f32 %v1290_v55, %v2215_v28 }
 0x7e3   : > { %v1294_v59 = vmul.f32 %v1666_v56, %v1291_v54 }
 0x7e4   : > { %1667 = vrsqrt.f32 %v1292_v58  ;;  %vm1312_vm10 = vcmp.eq.f32.partialorder %v1292_v58, inf  ;;  %v1315_v16 = vand.u32 2147483648, %v1292_v58  ;;  %vm1314_vm11 = vcmp.eq.f32.partialorder %v1292_v58, 0.0 }
 0x7e5   : > { %v1295_v60 = vmul.f32 %v1666_v56, %v1294_v59 }
 0x7e7   : > { %v1296_v10 = vmul.f32 0.5, %v1295_v60 }
 0x7e9   : > { %v1297_v61 = vsub.f32 1.5, %v1296_v10 }
 0x7ea   : > { %v1668_v62 = vpop.eup %1667 }
 0x7eb   : > { %v1298_v63 = vmul.f32 %v1666_v56, %v1297_v61  ;;  %v1306_v0 = vmul.f32 %v1668_v62, %v1292_v58 }
 0x7ed   : > { %v1299_v57 = vmul.f32 %v1298_v63, %v1291_v54  ;;  %v1307_v2 = vmul.f32 %v1668_v62, %v1306_v0 }
 0x7ef   : > { %v1301_v9 = vsel %vm1300_vm2, %v1291_v54, %v1299_v57  ;;  %v1308_v6 = vmul.f32 0.5, %v1307_v2 }
 0x7f0   : > { %v1304_v12 = vsel %vm1302_vm9, %v1303_v3, %v1301_v9 }
 0x7f1   : > { %v1317_v7 = vadd.f32 1e-06, %v1304_v12  ;;  %v1309_v14 = vsub.f32 1.5, %v1308_v6 }
 0x7f3   : > { %1669 = vrcp.f32 %v1317_v7  ;;  %v1310_v28 = vmul.f32 %v1668_v62, %v1309_v14  ;;  %v1330_v26 = vand.u32 2147483648, %v1317_v7  ;;  %v1328_v1 = vand.u32 2147483647, %v1317_v7 }
 0x7f4   : > { %vm1324_vm13 = vweird.f32 %v1317_v7 }
 0x7f5   : > { %v1311_v11 = vmul.f32 %v1310_v28, %v1292_v58  ;;  %v1331_v34 = vor.u32 1.1754944e-38, %v1330_v26  ;;  %vm1329_vm15 = vcmp.eq.f32.partialorder %v1328_v1, 8.507059e+37 }
 0x7f7   : > { %v1313_v20 = vsel %vm1312_vm10, %v1292_v58, %v1311_v11 }
 0x7f8   : > { %v1316_v23 = vsel %vm1314_vm11, %v1315_v16, %v1313_v20 }
 0x7f9   : > { %v1670_v5 = vpop.eup %1669  ;;  %v1318_v22 = vadd.f32 1e-06, %v1316_v23 }
 0x7fa   : > { %v1320_v24 = vmul.f32 %v1670_v5, %v1317_v7  ;;  %vm1325_vm12 = vweird.f32 %v1670_v5 }
 0x7fb   : > { %1671 = vrcp.f32 %v1318_v22  ;;  %vm1326_vm14 = vmor %vm1324_vm13, %vm1325_vm12  ;;  %v1344_v37 = vand.u32 2147483648, %v1318_v22  ;;  %v1342_v4 = vand.u32 2147483647, %v1318_v22  ;;  %vm1338_vm3 = vweird.f32 %v1318_v22 }
 0x7fc   : > { %v1321_v25 = vsub.f32 1.0, %v1320_v24 }
 0x7fd   : > { %v1345_v44 = vor.u32 1.1754944e-38, %v1344_v37  ;;  %vm1343_vm5 = vcmp.eq.f32.partialorder %v1342_v4, 8.507059e+37 }
 0x7fe   : > { %v1322_v27 = vmul.f32 %v1670_v5, %v1321_v25 }
 0x800   : > { %v1323_v32 = vadd.f32 %v1670_v5, %v1322_v27 }
 0x801   : > { %v1672_v33 = vpop.eup %1671 }
 0x802   : > { %v1327_v35 = vsel %vm1326_vm14, %v1670_v5, %v1323_v32  ;;  %v1334_v29 = vmul.f32 %v1672_v33, %v1318_v22  ;;  %vm1339_vm0 = vweird.f32 %v1672_v33 }
 0x803   : > { %v1332_v39 = vsel %vm1329_vm15, %v1331_v34, %v1327_v35  ;;  %vm1340_vm4 = vmor %vm1338_vm3, %vm1339_vm0 }
 0x804   : > { %v1335_v40 = vsub.f32 1.0, %v1334_v29  ;;  %v1347_v30 = vmul.f32 %v1332_v39, %v2242_v21 }
 0x806   : > { %v1336_v17 = vmul.f32 %v1672_v33, %v1335_v40  ;;  %v1350_v41 = vmul.f32 %v1349_v38, %v1347_v30 }
 0x808   : > { %v1337_v42 = vadd.f32 %v1672_v33, %v1336_v17  ;;  %v1353_v43 = vadd.f32 %v1352_v31, %v1350_v41 }
 0x80a   : > { %v1341_v45 = vsel %vm1340_vm4, %v1672_v33, %v1337_v42  ;;  %1355 = vst.msk [vmem:[#allocation7] sm:$0xff] %vm371_vm1, %v1353_v43 }
 0x80b   : > { %v1346_v46 = vsel %vm1343_vm5, %v1345_v44, %v1341_v45 }
 0x80c   : > { %v1348_v47 = vmul.f32 %v1346_v46, %v2248_v19 }
 0x80e   : > { %v1351_v48 = vmul.f32 %v1349_v38, %v1348_v47 }
 0x810   : > { %v1354_v49 = vadd.f32 %v1352_v31, %v1351_v48 }
 0x812   : > { %1356 = vst.msk [vmem:[#allocation7 + $0x8] sm:$0xff] %vm371_vm1, %v1354_v49 }
 0x813   : > { %1543 = dma.vmem_to_hbm [thread:$0]  (%p1557_p1), %s1363_s19, 256, %s1365_s8, [#allocation4], %s1820_s24, %s1820_s24, %s1815_s27  }
 0x814   : > { %1787 = dma.done.wait (%p1557_p1), [#allocation4], 256  }
 0x815   : > { %1789 = vsyncadd (%p1557_p1), [#allocation4], 4294967040 }
 0x816 PF: > { %p18_p3 = scmp.ge.s32.totalorder %s1893_s10, 4   ;;  %s2299_s21 = smov %s1796_s22 }
 0x817   : > { %s2300_s22 = smov %s1800_s23  ;;  %s2301_s23 = smov %s1903_s13 }
 0x818   : > { %s2302_s24 = smov %s1893_s10  ;;  %20 = sbr.rel (!%p18_p3) target bundleno = 5 (0x5), region = 102 }
 0x81d   :  { %1381 = vsyncpa [#allocation3], 1 }
 0x81e   :  { %1383 = vsyncpa [#allocation3 + $0x1], 1 }
 0x81f   :  { %1384 = vsyncpa [#allocation6], 1 }
 0x820   :  { %1386 = vsyncpa [#allocation6 + $0x1], 1 }
 0x821   :  { %1387 = vsyncpa [#allocation4], 1 }
 0x822   :  { %1389 = vsyncpa [#allocation4 + $0x1], 1 }

</bundles_post_ra>
